<compile_context>
chip_gen: v7x
topology: tpu7x:2x2x1
jax: 0.10.0
libtpu: 0.0.40
codegen_flags: <defaults>
</compile_context>

<pallas_src>
import jax
import jax.numpy as jnp
import numpy as np
from jax import lax
from jax.experimental import pallas as pl
from jax.experimental.pallas import tpu as pltpu


# ----------------------------- Pallas kernel --------------------------------

def bigru_fc_kernel(x_ref,                        # (T, B_blk, E) time-major
                    wihf_ref, bihf_ref,           # (E, 3H), (1, 3H)  fwd dir
                    wihb_ref, bihb_ref,           # (E, 3H), (1, 3H)  bwd dir
                    whhc_ref, bhhc_ref,           # (2H, 6H) block-diag, (1, 6H)
                    wfc_ref, bfc_ref,             # (2H, C), (1, C)
                    out_ref,                      # (B_blk, W) = [ht|logits|probs|pad]
                    gif_ref, gib_ref):            # VMEM scratch (T*B_blk, 3H) x2
    T, B, E = x_ref.shape
    H2 = whhc_ref.shape[0]          # 2H
    H = H2 // 2
    G = 3 * H
    C = wfc_ref.shape[1]
    f32 = jnp.float32
    mm_dtype = whhc_ref.dtype       # bf16 on v6e/v7x path, f32 otherwise

    # ---- Hoisted input projection: one (T*B,E)@(E,3H) matmul per direction
    # (bias folded in), written into VMEM scratch.  Per-step reads below are
    # cheap sublane-aligned row loads; nothing large stays live across the
    # time loop (bounds vreg pressure / spills).
    x = x_ref[...].reshape(T * B, E).astype(mm_dtype)
    gif_ref[...] = (jnp.dot(x, wihf_ref[...], preferred_element_type=f32)
                    + bihf_ref[...])
    gib_ref[...] = (jnp.dot(x, wihb_ref[...], preferred_element_type=f32)
                    + bihb_ref[...])

    # ---- Resident fused hidden weight (block-diag fwd/bwd) + pre-broadcast bias.
    w_hh = whhc_ref[...]                                      # (2H, 6H)
    b_hh = jnp.broadcast_to(bhhc_ref[...], (B, 2 * G))        # hoisted broadcast

    def step(i, h):
        # h: (B, 2H) = [h_f | h_b], float32.
        off_f = i * B
        off_b = (T - 1 - i) * B
        if not isinstance(off_f, int):            # dynamic loop index path
            off_f = pl.multiple_of(off_f, 8)
            off_b = pl.multiple_of(off_b, 8)
        gi_f = gif_ref[pl.ds(off_f, B), :]        # (B, 3H)
        gi_b = gib_ref[pl.ds(off_b, B), :]        # (B, 3H)

        # ONE fused MXU matmul per step covering BOTH directions.
        gh = jnp.dot(h.astype(mm_dtype), w_hh,
                     preferred_element_type=f32) + b_hh       # (B, 6H)

        def cell(gi, gh_d, h_d):
            # PyTorch nn.GRU gate order [r, z, n]; gi already includes b_ih.
            rz = jax.nn.sigmoid(gi[:, :2 * H] + gh_d[:, :2 * H])
            r = rz[:, :H]
            z = rz[:, H:]
            n = jnp.tanh(gi[:, 2 * H:] + r * gh_d[:, 2 * H:])
            return (1.0 - z) * n + z * h_d

        h_f = cell(gi_f, gh[:, :G], h[:, :H])
        h_b = cell(gi_b, gh[:, G:], h[:, H:])
        return jnp.concatenate([h_f, h_b], axis=1)            # (B, 2H)

    h0 = jnp.zeros((B, H2), f32)
    if T <= 16:
        # Small T: full static unroll -> static, sublane-aligned scratch offsets.
        h = h0
        for i in range(T):
            h = step(i, h)
    else:
        # Large T: bounded unroll keeps IR/compile time and live ranges in check
        # (gi liveness already bounded by the scratch refs).
        h = lax.fori_loop(0, T, step, h0, unroll=8)

    # fc head on the packed (B, 2H) state: single matmul, no per-direction split.
    logits = jnp.dot(h, wfc_ref[...], preferred_element_type=f32) + bfc_ref[...]

    # softmax(dim=1); divide via EUP approx reciprocal (returned probs only; the
    # training loss is computed from an exact log-softmax of logits outside).
    m = jnp.max(logits, axis=1, keepdims=True)
    e = jnp.exp(logits - m)
    probs = e * pl.reciprocal(jnp.sum(e, axis=1, keepdims=True), approx=True)

    # Single lane-dense output slab [ht | logits | probs | 0-pad] -> one
    # unmasked full-width store instead of three narrow masked stores.
    pad = out_ref.shape[1] - (H2 + 2 * C)
    parts = [h, logits, probs]
    if pad:
        parts.append(jnp.zeros((B, pad), f32))
    out_ref[...] = jnp.concatenate(parts, axis=1)


# ------------------------------ JAX wrapper ----------------------------------

def _run_bigru_fc(emb_tbe, params, compute_dtype=jnp.float32):
    """emb_tbe: (T, B, E) float32 time-major embeddings.

    Returns (probs, ht, logits) at batch B.  `compute_dtype=jnp.bfloat16`
    enables MXU-native matmul operands on v6e/v7x (gate math stays f32).
    """
    T, B, E = emb_tbe.shape
    H = params["w_hh_f"].shape[0]
    C = params["w_fc"].shape[1]
    H2 = 2 * H
    G = 3 * H
    cd = compute_dtype

    # Batch tiled in blocks of 8 sublane rows; the batch grid axis is marked
    # "parallel" so it splits across the two TensorCores on v7x.
    B_blk = 8
    B_pad = ((B + B_blk - 1) // B_blk) * B_blk
    n_blk = B_pad // B_blk

    x = emb_tbe.astype(jnp.float32)
    if B_pad != B:
        x = jnp.pad(x, ((0, 0), (0, B_pad - B), (0, 0)))

    # Block-diagonal fused hidden weight: one (B,2H)@(2H,6H) matmul per timestep
    # instead of two (B,H)@(H,3H) matmuls on the serial chain.
    zeros = jnp.zeros((H, G), cd)
    w_hh_c = jnp.concatenate(
        [jnp.concatenate([params["w_hh_f"].astype(cd), zeros], axis=1),
         jnp.concatenate([zeros, params["w_hh_b"].astype(cd)], axis=1)], axis=0)
    b_hh_c = jnp.concatenate([params["b_hh_f"], params["b_hh_b"]],
                             axis=1).astype(jnp.float32)           # (1, 6H)

    # Lane-dense output slab width: [ht(2H) | logits(C) | probs(C)] rounded to 128.
    W_out = ((H2 + 2 * C + 127) // 128) * 128

    args = (
        x,
        params["w_ih_f"].astype(cd), params["b_ih_f"].astype(jnp.float32),
        params["w_ih_b"].astype(cd), params["b_ih_b"].astype(jnp.float32),
        w_hh_c, b_hh_c,
        params["w_fc"].astype(jnp.float32), params["b_fc"].astype(jnp.float32),
    )

    def _param_spec(a):
        nd = a.ndim
        return pl.BlockSpec(a.shape, lambda b, _nd=nd: (0,) * _nd)

    in_specs = [pl.BlockSpec((T, B_blk, E), lambda b: (0, b, 0))]
    in_specs += [_param_spec(a) for a in args[1:]]

    out = pl.pallas_call(
        bigru_fc_kernel,
        out_shape=jax.ShapeDtypeStruct((B_pad, W_out), jnp.float32),
        grid=(n_blk,),
        in_specs=in_specs,
        out_specs=pl.BlockSpec((B_blk, W_out), lambda b: (b, 0)),
        scratch_shapes=[pltpu.VMEM((T * B_blk, G), jnp.float32),
                        pltpu.VMEM((T * B_blk, G), jnp.float32)],
        compiler_params=pltpu.CompilerParams(
            dimension_semantics=("parallel",),          # -> 2 TCs on v7x
            vmem_limit_bytes=32 * 1024 * 1024),
    )(*args)
    # TODO(synk): at RoBERTa scale (T=512, B=32, H=768) the x block and gi
    # scratch must be T-chunked and double-buffered from HBM (memory_space=pl.ANY
    # + pltpu.make_async_copy), with the chunk sized per generation's VMEM
    # (smaller / bf16 on v7x's 64 MiB); unnecessary at these toy sizes.

    ht = out[:B, :H2]
    logits = out[:B, H2:H2 + C]
    probs = out[:B, H2 + C:H2 + 2 * C]
    return probs, ht, logits


def bilstm_roberta_forward(seq, params, label=None, sim=None, mode="test",
                           compute_dtype=jnp.float32):
    """Mirrors BiLSTM_roberta.forward (non-BERT path).

    mode='test'       -> (probs, ht, logits)
    mode='inference'  -> (probs, ht)      (seq is pre-embedded (B,T,E))
    mode='validation' -> (argmax(label), argmax(probs), ht)
    mode='ind_pre' / 'finetune' (sup_cont=False) -> ce_loss
    """
    if mode == "inference":
        emb_tbe = jnp.swapaxes(jnp.asarray(seq, jnp.float32), 0, 1)   # (T,B,E)
    else:
        # nn.Embedding lookup, gathered directly in time-major order so the big
        # (T,B,E) activation never needs an XLA transpose (only the ids do).
        emb_tbe = jnp.take(params["embedding"], seq.T, axis=0).astype(jnp.float32)
        # TODO(synk): nn.Dropout(p=0.5) omitted (eval / inference semantics).

    probs, ht, logits = _run_bigru_fc(emb_tbe, params, compute_dtype=compute_dtype)

    if mode == "test":
        return probs, ht, logits
    if mode == "inference":
        return probs, ht
    if mode == "validation":
        return jnp.argmax(label, axis=1), jnp.argmax(probs, axis=1), ht
    if mode in ("ind_pre", "finetune"):
        # Loss from an exact log-softmax of the kernel logits (no approx recip).
        if sim is not None:
            adj = label * (logits - 0.35) + (1.0 - label) * logits   # lmcl_loss
            logp = jax.nn.log_softmax(adj, axis=1)
        else:
            logp = jax.nn.log_softmax(logits, axis=1)
        ce_loss = jnp.sum(-logp * label)
        # TODO(synk): sup_cont adversarial branch (nt_xent on input-grad noise)
        # requires autograd through the recurrence; not implemented in-kernel.
        return ce_loss
    raise ValueError("undefined mode")


# --------------------------- pure-JAX reference ------------------------------

def _reference_forward(emb, params):
    B, T, E = emb.shape
    H = params["w_hh_f"].shape[0]

    def run_dir(w_ih, w_hh, b_ih, b_hh, reverse):
        xs = emb[:, ::-1, :] if reverse else emb
        xs = jnp.swapaxes(xs, 0, 1)  # (T, B, E)

        def step(h, x_t):
            gi = x_t @ w_ih + b_ih
            gh = h @ w_hh + b_hh
            r = jax.nn.sigmoid(gi[:, :H] + gh[:, :H])
            z = jax.nn.sigmoid(gi[:, H:2 * H] + gh[:, H:2 * H])
            n = jnp.tanh(gi[:, 2 * H:] + r * gh[:, 2 * H:])
            return (1.0 - z) * n + z * h, None

        h, _ = lax.scan(step, jnp.zeros((B, H), jnp.float32), xs)
        return h

    h_f = run_dir(params["w_ih_f"], params["w_hh_f"],
                  params["b_ih_f"], params["b_hh_f"], False)
    h_b = run_dir(params["w_ih_b"], params["w_hh_b"],
                  params["b_ih_b"], params["b_hh_b"], True)
    ht = jnp.concatenate([h_f, h_b], axis=1)
    logits = ht @ params["w_fc"] + params["b_fc"]
    probs = jax.nn.softmax(logits, axis=1)
    return probs, ht, logits


# --------------------------------- main ---------------------------------------

if __name__ == "__main__":
    B, T = 2, 8          # batch, sequence length
    VOCAB, E = 50, 32    # embedding_matrix shape
    H = 32               # HIDDEN_DIM
    C = 8                # n_class_seen

    key = jax.random.PRNGKey(0)
    ks = jax.random.split(key, 13)
    s = 0.1

    # NOTE: PyTorch nn.GRU stores weight_ih as (3H, E) / weight_hh as (3H, H)
    # with gate order [r, z, n]; these params are the pre-transposed (E,3H) /
    # (H,3H) layout — checkpoint import must transpose.
    params = {
        "embedding": jax.random.normal(ks[0], (VOCAB, E), jnp.float32) * s,
        # forward GRU direction
        "w_ih_f": jax.random.normal(ks[1], (E, 3 * H), jnp.float32) * s,
        "w_hh_f": jax.random.normal(ks[2], (H, 3 * H), jnp.float32) * s,
        "b_ih_f": jax.random.normal(ks[3], (1, 3 * H), jnp.float32) * s,
        "b_hh_f": jax.random.normal(ks[4], (1, 3 * H), jnp.float32) * s,
        # backward GRU direction
        "w_ih_b": jax.random.normal(ks[5], (E, 3 * H), jnp.float32) * s,
        "w_hh_b": jax.random.normal(ks[6], (H, 3 * H), jnp.float32) * s,
        "b_ih_b": jax.random.normal(ks[7], (1, 3 * H), jnp.float32) * s,
        "b_hh_b": jax.random.normal(ks[8], (1, 3 * H), jnp.float32) * s,
        # fc head
        "w_fc": jax.random.normal(ks[9], (2 * H, C), jnp.float32) * s,
        "b_fc": jax.random.normal(ks[10], (1, C), jnp.float32) * s,
    }

    seq_ids = jax.random.randint(ks[11], (B, T), 0, VOCAB)
    labels = jax.nn.one_hot(
        jax.random.randint(ks[12], (B,), 0, C), C, dtype=jnp.float32)

    # ---- f32 path, mode='test' -> (probs, ht, logits), validated tightly.
    probs, ht, logits = jax.block_until_ready(
        bilstm_roberta_forward(seq_ids, params, mode="test"))

    emb = jnp.take(params["embedding"], seq_ids, axis=0).astype(jnp.float32)
    probs_r, ht_r, logits_r = _reference_forward(emb, params)

    np.testing.assert_allclose(np.asarray(ht), np.asarray(ht_r),
                               atol=1e-4, rtol=1e-4)
    np.testing.assert_allclose(np.asarray(logits), np.asarray(logits_r),
                               atol=1e-4, rtol=1e-4)
    # probs tolerance loosened because of pl.reciprocal(approx=True).
    np.testing.assert_allclose(np.asarray(probs), np.asarray(probs_r),
                               atol=2e-3, rtol=2e-3)

    # ---- mode='ind_pre' (sup_cont=False, sim=None) -> cross-entropy loss
    # (exact log-softmax path, no approx reciprocal in the loss).
    ce_loss = jax.block_until_ready(
        bilstm_roberta_forward(seq_ids, params, label=labels, mode="ind_pre"))
    ce_ref = float(jnp.sum(-jax.nn.log_softmax(logits_r, axis=1) * labels))
    assert np.isfinite(float(ce_loss))
    np.testing.assert_allclose(float(ce_loss), ce_ref, atol=1e-4, rtol=1e-4)

    # ---- bf16-matmul path (MXU-native on v6e/v7x); loose tolerance vs f32 ref.
    probs_b, ht_b, logits_b = jax.block_until_ready(
        bilstm_roberta_forward(seq_ids, params, mode="test",
                               compute_dtype=jnp.bfloat16))
    np.testing.assert_allclose(np.asarray(ht_b), np.asarray(ht_r),
                               atol=2e-2, rtol=2e-1)
    np.testing.assert_allclose(np.asarray(logits_b), np.asarray(logits_r),
                               atol=2e-2, rtol=2e-1)
    np.testing.assert_allclose(np.asarray(probs_b), np.asarray(probs_r),
                               atol=2e-2, rtol=2e-1)

    print("KERNEL_OK")
</pallas_src>

<mosaic_0001>
module attributes {stable_mosaic.version = 11 : i64} {
  func.func @bigru_fc_kernel(%arg0: i32, %arg1: memref<8x8x32xf32, #tpu.memory_space<vmem>>, %arg2: memref<32x96xf32, #tpu.memory_space<vmem>>, %arg3: memref<1x96xf32, #tpu.memory_space<vmem>>, %arg4: memref<32x96xf32, #tpu.memory_space<vmem>>, %arg5: memref<1x96xf32, #tpu.memory_space<vmem>>, %arg6: memref<64x192xf32, #tpu.memory_space<vmem>>, %arg7: memref<1x192xf32, #tpu.memory_space<vmem>>, %arg8: memref<64x8xf32, #tpu.memory_space<vmem>>, %arg9: memref<1x8xf32, #tpu.memory_space<vmem>>, %arg10: memref<8x128xf32, #tpu.memory_space<vmem>>, %arg11: memref<64x96xf32, #tpu.memory_space<vmem>>, %arg12: memref<64x96xf32, #tpu.memory_space<vmem>>) attributes {dimension_semantics = [#tpu.dimension_semantics<parallel>], iteration_bounds = array<i64: 1>, scalar_prefetch = 0 : i64, scratch_operands = 2 : i64, tpu.core_type = #tpu.core_type<tc>, window_params = [{transform_indices = @transform_0, window_bounds = array<i64: 8, 8, 32>}, {pipeline_mode = #tpu.pipeline_mode<synchronous>, transform_indices = @transform_1, window_bounds = array<i64: 32, 96>}, {pipeline_mode = #tpu.pipeline_mode<synchronous>, transform_indices = @transform_2, window_bounds = array<i64: 1, 96>}, {pipeline_mode = #tpu.pipeline_mode<synchronous>, transform_indices = @transform_3, window_bounds = array<i64: 32, 96>}, {pipeline_mode = #tpu.pipeline_mode<synchronous>, transform_indices = @transform_4, window_bounds = array<i64: 1, 96>}, {pipeline_mode = #tpu.pipeline_mode<synchronous>, transform_indices = @transform_5, window_bounds = array<i64: 64, 192>}, {pipeline_mode = #tpu.pipeline_mode<synchronous>, transform_indices = @transform_6, window_bounds = array<i64: 1, 192>}, {pipeline_mode = #tpu.pipeline_mode<synchronous>, transform_indices = @transform_7, window_bounds = array<i64: 64, 8>}, {pipeline_mode = #tpu.pipeline_mode<synchronous>, transform_indices = @transform_8, window_bounds = array<i64: 1, 8>}, {transform_indices = @transform_9, window_bounds = array<i64: 8, 128>}]} {
    %c0 = arith.constant 0 : index
    %c0_0 = arith.constant 0 : index
    %c0_1 = arith.constant 0 : index
    %0 = vector.load %arg1[%c0, %c0_0, %c0_1] : memref<8x8x32xf32, #tpu.memory_space<vmem>>, vector<8x8x32xf32>
    %1 = vector.shape_cast %0 : vector<8x8x32xf32> to vector<64x32xf32>
    %c0_2 = arith.constant 0 : index
    %c0_3 = arith.constant 0 : index
    %2 = vector.load %arg2[%c0_2, %c0_3] : memref<32x96xf32, #tpu.memory_space<vmem>>, vector<32x96xf32>
    %cst = arith.constant dense<0.000000e+00> : vector<64x96xf32>
    %3 = tpu.matmul %1, %2, %cst {dimension_numbers = #tpu.dot_dimension_numbers<[1], [0], [0], [1], [0, 0, 1, 1], [], []>} : vector<64x32xf32>, vector<32x96xf32>, vector<64x96xf32> -> vector<64x96xf32>
    %c0_4 = arith.constant 0 : index
    %c0_5 = arith.constant 0 : index
    %4 = vector.load %arg3[%c0_4, %c0_5] : memref<1x96xf32, #tpu.memory_space<vmem>>, vector<1x96xf32>
    %5 = vector.broadcast %4 : vector<1x96xf32> to vector<64x96xf32>
    %6 = arith.addf %3, %5 : vector<64x96xf32>
    %c0_6 = arith.constant 0 : index
    %c0_7 = arith.constant 0 : index
    %7 = vector.load %arg11[%c0_6, %c0_7] : memref<64x96xf32, #tpu.memory_space<vmem>>, vector<64x96xf32>
    tpu.vector_store %arg11[%c0_6, %c0_7], %6 {strides = array<i32>} : memref<64x96xf32, #tpu.memory_space<vmem>>, vector<64x96xf32>,
    %c0_8 = arith.constant 0 : index
    %c0_9 = arith.constant 0 : index
    %8 = vector.load %arg4[%c0_8, %c0_9] : memref<32x96xf32, #tpu.memory_space<vmem>>, vector<32x96xf32>
    %cst_10 = arith.constant dense<0.000000e+00> : vector<64x96xf32>
    %9 = tpu.matmul %1, %8, %cst_10 {dimension_numbers = #tpu.dot_dimension_numbers<[1], [0], [0], [1], [0, 0, 1, 1], [], []>} : vector<64x32xf32>, vector<32x96xf32>, vector<64x96xf32> -> vector<64x96xf32>
    %c0_11 = arith.constant 0 : index
    %c0_12 = arith.constant 0 : index
    %10 = vector.load %arg5[%c0_11, %c0_12] : memref<1x96xf32, #tpu.memory_space<vmem>>, vector<1x96xf32>
    %11 = vector.broadcast %10 : vector<1x96xf32> to vector<64x96xf32>
    %12 = arith.addf %9, %11 : vector<64x96xf32>
    %c0_13 = arith.constant 0 : index
    %c0_14 = arith.constant 0 : index
    %13 = vector.load %arg12[%c0_13, %c0_14] : memref<64x96xf32, #tpu.memory_space<vmem>>, vector<64x96xf32>
    tpu.vector_store %arg12[%c0_13, %c0_14], %12 {strides = array<i32>} : memref<64x96xf32, #tpu.memory_space<vmem>>, vector<64x96xf32>,
    %c0_15 = arith.constant 0 : index
    %c0_16 = arith.constant 0 : index
    %14 = vector.load %arg6[%c0_15, %c0_16] : memref<64x192xf32, #tpu.memory_space<vmem>>, vector<64x192xf32>
    %c0_17 = arith.constant 0 : index
    %c0_18 = arith.constant 0 : index
    %15 = vector.load %arg7[%c0_17, %c0_18] : memref<1x192xf32, #tpu.memory_space<vmem>>, vector<1x192xf32>
    %16 = vector.shape_cast %15 : vector<1x192xf32> to vector<1x192xf32>
    %17 = vector.broadcast %16 : vector<1x192xf32> to vector<8x192xf32>
    %cst_19 = arith.constant 0.000000e+00 : f32
    %18 = vector.broadcast %cst_19 : f32 to vector<8x64xf32>
    %c0_20 = arith.constant 0 : index
    %c0_21 = arith.constant 0 : index
    %19 = vector.load %arg11[%c0_20, %c0_21] : memref<64x96xf32, #tpu.memory_space<vmem>>, vector<8x96xf32>
    %c56 = arith.constant 56 : index
    %c0_22 = arith.constant 0 : index
    %20 = vector.load %arg12[%c56, %c0_22] : memref<64x96xf32, #tpu.memory_space<vmem>>, vector<8x96xf32>
    %cst_23 = arith.constant dense<0.000000e+00> : vector<8x192xf32>
    %21 = tpu.matmul %18, %14, %cst_23 {dimension_numbers = #tpu.dot_dimension_numbers<[1], [0], [0], [1], [0, 0, 1, 1], [], []>} : vector<8x64xf32>, vector<64x192xf32>, vector<8x192xf32> -> vector<8x192xf32>
    %22 = arith.addf %21, %17 : vector<8x192xf32>
    %23 = vector.extract_strided_slice %22 {offsets = [0, 0], sizes = [8, 96], strides = [1, 1]} : vector<8x192xf32> to vector<8x96xf32>
    %24 = vector.extract_strided_slice %18 {offsets = [0, 0], sizes = [8, 32], strides = [1, 1]} : vector<8x64xf32> to vector<8x32xf32>
    %25 = vector.extract_strided_slice %19 {offsets = [0, 0], sizes = [8, 64], strides = [1, 1]} : vector<8x96xf32> to vector<8x64xf32>
    %26 = vector.extract_strided_slice %23 {offsets = [0, 0], sizes = [8, 64], strides = [1, 1]} : vector<8x96xf32> to vector<8x64xf32>
    %27 = arith.addf %25, %26 : vector<8x64xf32>
    %28 = arith.negf %27 : vector<8x64xf32>
    %29 = math.exp %28 : vector<8x64xf32>
    %cst_24 = arith.constant 1.000000e+00 : f32
    %30 = vector.broadcast %cst_24 : f32 to vector<8x64xf32>
    %31 = arith.addf %30, %29 : vector<8x64xf32>
    %32 = arith.divf %30, %31 : vector<8x64xf32>
    %33 = vector.extract_strided_slice %32 {offsets = [0, 0], sizes = [8, 32], strides = [1, 1]} : vector<8x64xf32> to vector<8x32xf32>
    %34 = vector.extract_strided_slice %32 {offsets = [0, 32], sizes = [8, 32], strides = [1, 1]} : vector<8x64xf32> to vector<8x32xf32>
    %35 = vector.extract_strided_slice %19 {offsets = [0, 64], sizes = [8, 32], strides = [1, 1]} : vector<8x96xf32> to vector<8x32xf32>
    %36 = vector.extract_strided_slice %23 {offsets = [0, 64], sizes = [8, 32], strides = [1, 1]} : vector<8x96xf32> to vector<8x32xf32>
    %37 = arith.mulf %33, %36 : vector<8x32xf32>
    %38 = arith.addf %35, %37 : vector<8x32xf32>
    %39 = math.tanh %38 : vector<8x32xf32>
    %cst_25 = arith.constant 1.000000e+00 : f32
    %40 = vector.broadcast %cst_25 : f32 to vector<8x32xf32>
    %41 = arith.subf %40, %34 : vector<8x32xf32>
    %42 = arith.mulf %41, %39 : vector<8x32xf32>
    %43 = arith.mulf %34, %24 : vector<8x32xf32>
    %44 = arith.addf %42, %43 : vector<8x32xf32>
    %45 = vector.extract_strided_slice %22 {offsets = [0, 96], sizes = [8, 96], strides = [1, 1]} : vector<8x192xf32> to vector<8x96xf32>
    %46 = vector.extract_strided_slice %18 {offsets = [0, 32], sizes = [8, 32], strides = [1, 1]} : vector<8x64xf32> to vector<8x32xf32>
    %47 = vector.extract_strided_slice %20 {offsets = [0, 0], sizes = [8, 64], strides = [1, 1]} : vector<8x96xf32> to vector<8x64xf32>
    %48 = vector.extract_strided_slice %45 {offsets = [0, 0], sizes = [8, 64], strides = [1, 1]} : vector<8x96xf32> to vector<8x64xf32>
    %49 = arith.addf %47, %48 : vector<8x64xf32>
    %50 = arith.negf %49 : vector<8x64xf32>
    %51 = math.exp %50 : vector<8x64xf32>
    %cst_26 = arith.constant 1.000000e+00 : f32
    %52 = vector.broadcast %cst_26 : f32 to vector<8x64xf32>
    %53 = arith.addf %52, %51 : vector<8x64xf32>
    %54 = arith.divf %52, %53 : vector<8x64xf32>
    %55 = vector.extract_strided_slice %54 {offsets = [0, 0], sizes = [8, 32], strides = [1, 1]} : vector<8x64xf32> to vector<8x32xf32>
    %56 = vector.extract_strided_slice %54 {offsets = [0, 32], sizes = [8, 32], strides = [1, 1]} : vector<8x64xf32> to vector<8x32xf32>
    %57 = vector.extract_strided_slice %20 {offsets = [0, 64], sizes = [8, 32], strides = [1, 1]} : vector<8x96xf32> to vector<8x32xf32>
    %58 = vector.extract_strided_slice %45 {offsets = [0, 64], sizes = [8, 32], strides = [1, 1]} : vector<8x96xf32> to vector<8x32xf32>
    %59 = arith.mulf %55, %58 : vector<8x32xf32>
    %60 = arith.addf %57, %59 : vector<8x32xf32>
    %61 = math.tanh %60 : vector<8x32xf32>
    %cst_27 = arith.constant 1.000000e+00 : f32
    %62 = vector.broadcast %cst_27 : f32 to vector<8x32xf32>
    %63 = arith.subf %62, %56 : vector<8x32xf32>
    %64 = arith.mulf %63, %61 : vector<8x32xf32>
    %65 = arith.mulf %56, %46 : vector<8x32xf32>
    %66 = arith.addf %64, %65 : vector<8x32xf32>
    %67 = tpu.concatenate %44, %66 in 1 : vector<8x32xf32>, vector<8x32xf32> -> vector<8x64xf32>
    %c8 = arith.constant 8 : index
    %c0_28 = arith.constant 0 : index
    %68 = vector.load %arg11[%c8, %c0_28] : memref<64x96xf32, #tpu.memory_space<vmem>>, vector<8x96xf32>
    %c48 = arith.constant 48 : index
    %c0_29 = arith.constant 0 : index
    %69 = vector.load %arg12[%c48, %c0_29] : memref<64x96xf32, #tpu.memory_space<vmem>>, vector<8x96xf32>
    %cst_30 = arith.constant dense<0.000000e+00> : vector<8x192xf32>
    %70 = tpu.matmul %67, %14, %cst_30 {dimension_numbers = #tpu.dot_dimension_numbers<[1], [0], [0], [1], [0, 0, 1, 1], [], []>} : vector<8x64xf32>, vector<64x192xf32>, vector<8x192xf32> -> vector<8x192xf32>
    %71 = arith.addf %70, %17 : vector<8x192xf32>
    %72 = vector.extract_strided_slice %71 {offsets = [0, 0], sizes = [8, 96], strides = [1, 1]} : vector<8x192xf32> to vector<8x96xf32>
    %73 = vector.extract_strided_slice %67 {offsets = [0, 0], sizes = [8, 32], strides = [1, 1]} : vector<8x64xf32> to vector<8x32xf32>
    %74 = vector.extract_strided_slice %68 {offsets = [0, 0], sizes = [8, 64], strides = [1, 1]} : vector<8x96xf32> to vector<8x64xf32>
    %75 = vector.extract_strided_slice %72 {offsets = [0, 0], sizes = [8, 64], strides = [1, 1]} : vector<8x96xf32> to vector<8x64xf32>
    %76 = arith.addf %74, %75 : vector<8x64xf32>
    %77 = arith.negf %76 : vector<8x64xf32>
    %78 = math.exp %77 : vector<8x64xf32>
    %cst_31 = arith.constant 1.000000e+00 : f32
    %79 = vector.broadcast %cst_31 : f32 to vector<8x64xf32>
    %80 = arith.addf %79, %78 : vector<8x64xf32>
    %81 = arith.divf %79, %80 : vector<8x64xf32>
    %82 = vector.extract_strided_slice %81 {offsets = [0, 0], sizes = [8, 32], strides = [1, 1]} : vector<8x64xf32> to vector<8x32xf32>
    %83 = vector.extract_strided_slice %81 {offsets = [0, 32], sizes = [8, 32], strides = [1, 1]} : vector<8x64xf32> to vector<8x32xf32>
    %84 = vector.extract_strided_slice %68 {offsets = [0, 64], sizes = [8, 32], strides = [1, 1]} : vector<8x96xf32> to vector<8x32xf32>
    %85 = vector.extract_strided_slice %72 {offsets = [0, 64], sizes = [8, 32], strides = [1, 1]} : vector<8x96xf32> to vector<8x32xf32>
    %86 = arith.mulf %82, %85 : vector<8x32xf32>
    %87 = arith.addf %84, %86 : vector<8x32xf32>
    %88 = math.tanh %87 : vector<8x32xf32>
    %cst_32 = arith.constant 1.000000e+00 : f32
    %89 = vector.broadcast %cst_32 : f32 to vector<8x32xf32>
    %90 = arith.subf %89, %83 : vector<8x32xf32>
    %91 = arith.mulf %90, %88 : vector<8x32xf32>
    %92 = arith.mulf %83, %73 : vector<8x32xf32>
    %93 = arith.addf %91, %92 : vector<8x32xf32>
    %94 = vector.extract_strided_slice %71 {offsets = [0, 96], sizes = [8, 96], strides = [1, 1]} : vector<8x192xf32> to vector<8x96xf32>
    %95 = vector.extract_strided_slice %67 {offsets = [0, 32], sizes = [8, 32], strides = [1, 1]} : vector<8x64xf32> to vector<8x32xf32>
    %96 = vector.extract_strided_slice %69 {offsets = [0, 0], sizes = [8, 64], strides = [1, 1]} : vector<8x96xf32> to vector<8x64xf32>
    %97 = vector.extract_strided_slice %94 {offsets = [0, 0], sizes = [8, 64], strides = [1, 1]} : vector<8x96xf32> to vector<8x64xf32>
    %98 = arith.addf %96, %97 : vector<8x64xf32>
    %99 = arith.negf %98 : vector<8x64xf32>
    %100 = math.exp %99 : vector<8x64xf32>
    %cst_33 = arith.constant 1.000000e+00 : f32
    %101 = vector.broadcast %cst_33 : f32 to vector<8x64xf32>
    %102 = arith.addf %101, %100 : vector<8x64xf32>
    %103 = arith.divf %101, %102 : vector<8x64xf32>
    %104 = vector.extract_strided_slice %103 {offsets = [0, 0], sizes = [8, 32], strides = [1, 1]} : vector<8x64xf32> to vector<8x32xf32>
    %105 = vector.extract_strided_slice %103 {offsets = [0, 32], sizes = [8, 32], strides = [1, 1]} : vector<8x64xf32> to vector<8x32xf32>
    %106 = vector.extract_strided_slice %69 {offsets = [0, 64], sizes = [8, 32], strides = [1, 1]} : vector<8x96xf32> to vector<8x32xf32>
    %107 = vector.extract_strided_slice %94 {offsets = [0, 64], sizes = [8, 32], strides = [1, 1]} : vector<8x96xf32> to vector<8x32xf32>
    %108 = arith.mulf %104, %107 : vector<8x32xf32>
    %109 = arith.addf %106, %108 : vector<8x32xf32>
    %110 = math.tanh %109 : vector<8x32xf32>
    %cst_34 = arith.constant 1.000000e+00 : f32
    %111 = vector.broadcast %cst_34 : f32 to vector<8x32xf32>
    %112 = arith.subf %111, %105 : vector<8x32xf32>
    %113 = arith.mulf %112, %110 : vector<8x32xf32>
    %114 = arith.mulf %105, %95 : vector<8x32xf32>
    %115 = arith.addf %113, %114 : vector<8x32xf32>
    %116 = tpu.concatenate %93, %115 in 1 : vector<8x32xf32>, vector<8x32xf32> -> vector<8x64xf32>
    %c16 = arith.constant 16 : index
    %c0_35 = arith.constant 0 : index
    %117 = vector.load %arg11[%c16, %c0_35] : memref<64x96xf32, #tpu.memory_space<vmem>>, vector<8x96xf32>
    %c40 = arith.constant 40 : index
    %c0_36 = arith.constant 0 : index
    %118 = vector.load %arg12[%c40, %c0_36] : memref<64x96xf32, #tpu.memory_space<vmem>>, vector<8x96xf32>
    %cst_37 = arith.constant dense<0.000000e+00> : vector<8x192xf32>
    %119 = tpu.matmul %116, %14, %cst_37 {dimension_numbers = #tpu.dot_dimension_numbers<[1], [0], [0], [1], [0, 0, 1, 1], [], []>} : vector<8x64xf32>, vector<64x192xf32>, vector<8x192xf32> -> vector<8x192xf32>
    %120 = arith.addf %119, %17 : vector<8x192xf32>
    %121 = vector.extract_strided_slice %120 {offsets = [0, 0], sizes = [8, 96], strides = [1, 1]} : vector<8x192xf32> to vector<8x96xf32>
    %122 = vector.extract_strided_slice %116 {offsets = [0, 0], sizes = [8, 32], strides = [1, 1]} : vector<8x64xf32> to vector<8x32xf32>
    %123 = vector.extract_strided_slice %117 {offsets = [0, 0], sizes = [8, 64], strides = [1, 1]} : vector<8x96xf32> to vector<8x64xf32>
    %124 = vector.extract_strided_slice %121 {offsets = [0, 0], sizes = [8, 64], strides = [1, 1]} : vector<8x96xf32> to vector<8x64xf32>
    %125 = arith.addf %123, %124 : vector<8x64xf32>
    %126 = arith.negf %125 : vector<8x64xf32>
    %127 = math.exp %126 : vector<8x64xf32>
    %cst_38 = arith.constant 1.000000e+00 : f32
    %128 = vector.broadcast %cst_38 : f32 to vector<8x64xf32>
    %129 = arith.addf %128, %127 : vector<8x64xf32>
    %130 = arith.divf %128, %129 : vector<8x64xf32>
    %131 = vector.extract_strided_slice %130 {offsets = [0, 0], sizes = [8, 32], strides = [1, 1]} : vector<8x64xf32> to vector<8x32xf32>
    %132 = vector.extract_strided_slice %130 {offsets = [0, 32], sizes = [8, 32], strides = [1, 1]} : vector<8x64xf32> to vector<8x32xf32>
    %133 = vector.extract_strided_slice %117 {offsets = [0, 64], sizes = [8, 32], strides = [1, 1]} : vector<8x96xf32> to vector<8x32xf32>
    %134 = vector.extract_strided_slice %121 {offsets = [0, 64], sizes = [8, 32], strides = [1, 1]} : vector<8x96xf32> to vector<8x32xf32>
    %135 = arith.mulf %131, %134 : vector<8x32xf32>
    %136 = arith.addf %133, %135 : vector<8x32xf32>
    %137 = math.tanh %136 : vector<8x32xf32>
    %cst_39 = arith.constant 1.000000e+00 : f32
    %138 = vector.broadcast %cst_39 : f32 to vector<8x32xf32>
    %139 = arith.subf %138, %132 : vector<8x32xf32>
    %140 = arith.mulf %139, %137 : vector<8x32xf32>
    %141 = arith.mulf %132, %122 : vector<8x32xf32>
    %142 = arith.addf %140, %141 : vector<8x32xf32>
    %143 = vector.extract_strided_slice %120 {offsets = [0, 96], sizes = [8, 96], strides = [1, 1]} : vector<8x192xf32> to vector<8x96xf32>
    %144 = vector.extract_strided_slice %116 {offsets = [0, 32], sizes = [8, 32], strides = [1, 1]} : vector<8x64xf32> to vector<8x32xf32>
    %145 = vector.extract_strided_slice %118 {offsets = [0, 0], sizes = [8, 64], strides = [1, 1]} : vector<8x96xf32> to vector<8x64xf32>
    %146 = vector.extract_strided_slice %143 {offsets = [0, 0], sizes = [8, 64], strides = [1, 1]} : vector<8x96xf32> to vector<8x64xf32>
    %147 = arith.addf %145, %146 : vector<8x64xf32>
    %148 = arith.negf %147 : vector<8x64xf32>
    %149 = math.exp %148 : vector<8x64xf32>
    %cst_40 = arith.constant 1.000000e+00 : f32
    %150 = vector.broadcast %cst_40 : f32 to vector<8x64xf32>
    %151 = arith.addf %150, %149 : vector<8x64xf32>
    %152 = arith.divf %150, %151 : vector<8x64xf32>
    %153 = vector.extract_strided_slice %152 {offsets = [0, 0], sizes = [8, 32], strides = [1, 1]} : vector<8x64xf32> to vector<8x32xf32>
    %154 = vector.extract_strided_slice %152 {offsets = [0, 32], sizes = [8, 32], strides = [1, 1]} : vector<8x64xf32> to vector<8x32xf32>
    %155 = vector.extract_strided_slice %118 {offsets = [0, 64], sizes = [8, 32], strides = [1, 1]} : vector<8x96xf32> to vector<8x32xf32>
    %156 = vector.extract_strided_slice %143 {offsets = [0, 64], sizes = [8, 32], strides = [1, 1]} : vector<8x96xf32> to vector<8x32xf32>
    %157 = arith.mulf %153, %156 : vector<8x32xf32>
    %158 = arith.addf %155, %157 : vector<8x32xf32>
    %159 = math.tanh %158 : vector<8x32xf32>
    %cst_41 = arith.constant 1.000000e+00 : f32
    %160 = vector.broadcast %cst_41 : f32 to vector<8x32xf32>
    %161 = arith.subf %160, %154 : vector<8x32xf32>
    %162 = arith.mulf %161, %159 : vector<8x32xf32>
    %163 = arith.mulf %154, %144 : vector<8x32xf32>
    %164 = arith.addf %162, %163 : vector<8x32xf32>
    %165 = tpu.concatenate %142, %164 in 1 : vector<8x32xf32>, vector<8x32xf32> -> vector<8x64xf32>
    %c24 = arith.constant 24 : index
    %c0_42 = arith.constant 0 : index
    %166 = vector.load %arg11[%c24, %c0_42] : memref<64x96xf32, #tpu.memory_space<vmem>>, vector<8x96xf32>
    %c32 = arith.constant 32 : index
    %c0_43 = arith.constant 0 : index
    %167 = vector.load %arg12[%c32, %c0_43] : memref<64x96xf32, #tpu.memory_space<vmem>>, vector<8x96xf32>
    %cst_44 = arith.constant dense<0.000000e+00> : vector<8x192xf32>
    %168 = tpu.matmul %165, %14, %cst_44 {dimension_numbers = #tpu.dot_dimension_numbers<[1], [0], [0], [1], [0, 0, 1, 1], [], []>} : vector<8x64xf32>, vector<64x192xf32>, vector<8x192xf32> -> vector<8x192xf32>
    %169 = arith.addf %168, %17 : vector<8x192xf32>
    %170 = vector.extract_strided_slice %169 {offsets = [0, 0], sizes = [8, 96], strides = [1, 1]} : vector<8x192xf32> to vector<8x96xf32>
    %171 = vector.extract_strided_slice %165 {offsets = [0, 0], sizes = [8, 32], strides = [1, 1]} : vector<8x64xf32> to vector<8x32xf32>
    %172 = vector.extract_strided_slice %166 {offsets = [0, 0], sizes = [8, 64], strides = [1, 1]} : vector<8x96xf32> to vector<8x64xf32>
    %173 = vector.extract_strided_slice %170 {offsets = [0, 0], sizes = [8, 64], strides = [1, 1]} : vector<8x96xf32> to vector<8x64xf32>
    %174 = arith.addf %172, %173 : vector<8x64xf32>
    %175 = arith.negf %174 : vector<8x64xf32>
    %176 = math.exp %175 : vector<8x64xf32>
    %cst_45 = arith.constant 1.000000e+00 : f32
    %177 = vector.broadcast %cst_45 : f32 to vector<8x64xf32>
    %178 = arith.addf %177, %176 : vector<8x64xf32>
    %179 = arith.divf %177, %178 : vector<8x64xf32>
    %180 = vector.extract_strided_slice %179 {offsets = [0, 0], sizes = [8, 32], strides = [1, 1]} : vector<8x64xf32> to vector<8x32xf32>
    %181 = vector.extract_strided_slice %179 {offsets = [0, 32], sizes = [8, 32], strides = [1, 1]} : vector<8x64xf32> to vector<8x32xf32>
    %182 = vector.extract_strided_slice %166 {offsets = [0, 64], sizes = [8, 32], strides = [1, 1]} : vector<8x96xf32> to vector<8x32xf32>
    %183 = vector.extract_strided_slice %170 {offsets = [0, 64], sizes = [8, 32], strides = [1, 1]} : vector<8x96xf32> to vector<8x32xf32>
    %184 = arith.mulf %180, %183 : vector<8x32xf32>
    %185 = arith.addf %182, %184 : vector<8x32xf32>
    %186 = math.tanh %185 : vector<8x32xf32>
    %cst_46 = arith.constant 1.000000e+00 : f32
    %187 = vector.broadcast %cst_46 : f32 to vector<8x32xf32>
    %188 = arith.subf %187, %181 : vector<8x32xf32>
    %189 = arith.mulf %188, %186 : vector<8x32xf32>
    %190 = arith.mulf %181, %171 : vector<8x32xf32>
    %191 = arith.addf %189, %190 : vector<8x32xf32>
    %192 = vector.extract_strided_slice %169 {offsets = [0, 96], sizes = [8, 96], strides = [1, 1]} : vector<8x192xf32> to vector<8x96xf32>
    %193 = vector.extract_strided_slice %165 {offsets = [0, 32], sizes = [8, 32], strides = [1, 1]} : vector<8x64xf32> to vector<8x32xf32>
    %194 = vector.extract_strided_slice %167 {offsets = [0, 0], sizes = [8, 64], strides = [1, 1]} : vector<8x96xf32> to vector<8x64xf32>
    %195 = vector.extract_strided_slice %192 {offsets = [0, 0], sizes = [8, 64], strides = [1, 1]} : vector<8x96xf32> to vector<8x64xf32>
    %196 = arith.addf %194, %195 : vector<8x64xf32>
    %197 = arith.negf %196 : vector<8x64xf32>
    %198 = math.exp %197 : vector<8x64xf32>
    %cst_47 = arith.constant 1.000000e+00 : f32
    %199 = vector.broadcast %cst_47 : f32 to vector<8x64xf32>
    %200 = arith.addf %199, %198 : vector<8x64xf32>
    %201 = arith.divf %199, %200 : vector<8x64xf32>
    %202 = vector.extract_strided_slice %201 {offsets = [0, 0], sizes = [8, 32], strides = [1, 1]} : vector<8x64xf32> to vector<8x32xf32>
    %203 = vector.extract_strided_slice %201 {offsets = [0, 32], sizes = [8, 32], strides = [1, 1]} : vector<8x64xf32> to vector<8x32xf32>
    %204 = vector.extract_strided_slice %167 {offsets = [0, 64], sizes = [8, 32], strides = [1, 1]} : vector<8x96xf32> to vector<8x32xf32>
    %205 = vector.extract_strided_slice %192 {offsets = [0, 64], sizes = [8, 32], strides = [1, 1]} : vector<8x96xf32> to vector<8x32xf32>
    %206 = arith.mulf %202, %205 : vector<8x32xf32>
    %207 = arith.addf %204, %206 : vector<8x32xf32>
    %208 = math.tanh %207 : vector<8x32xf32>
    %cst_48 = arith.constant 1.000000e+00 : f32
    %209 = vector.broadcast %cst_48 : f32 to vector<8x32xf32>
    %210 = arith.subf %209, %203 : vector<8x32xf32>
    %211 = arith.mulf %210, %208 : vector<8x32xf32>
    %212 = arith.mulf %203, %193 : vector<8x32xf32>
    %213 = arith.addf %211, %212 : vector<8x32xf32>
    %214 = tpu.concatenate %191, %213 in 1 : vector<8x32xf32>, vector<8x32xf32> -> vector<8x64xf32>
    %c32_49 = arith.constant 32 : index
    %c0_50 = arith.constant 0 : index
    %215 = vector.load %arg11[%c32_49, %c0_50] : memref<64x96xf32, #tpu.memory_space<vmem>>, vector<8x96xf32>
    %c24_51 = arith.constant 24 : index
    %c0_52 = arith.constant 0 : index
    %216 = vector.load %arg12[%c24_51, %c0_52] : memref<64x96xf32, #tpu.memory_space<vmem>>, vector<8x96xf32>
    %cst_53 = arith.constant dense<0.000000e+00> : vector<8x192xf32>
    %217 = tpu.matmul %214, %14, %cst_53 {dimension_numbers = #tpu.dot_dimension_numbers<[1], [0], [0], [1], [0, 0, 1, 1], [], []>} : vector<8x64xf32>, vector<64x192xf32>, vector<8x192xf32> -> vector<8x192xf32>
    %218 = arith.addf %217, %17 : vector<8x192xf32>
    %219 = vector.extract_strided_slice %218 {offsets = [0, 0], sizes = [8, 96], strides = [1, 1]} : vector<8x192xf32> to vector<8x96xf32>
    %220 = vector.extract_strided_slice %214 {offsets = [0, 0], sizes = [8, 32], strides = [1, 1]} : vector<8x64xf32> to vector<8x32xf32>
    %221 = vector.extract_strided_slice %215 {offsets = [0, 0], sizes = [8, 64], strides = [1, 1]} : vector<8x96xf32> to vector<8x64xf32>
    %222 = vector.extract_strided_slice %219 {offsets = [0, 0], sizes = [8, 64], strides = [1, 1]} : vector<8x96xf32> to vector<8x64xf32>
    %223 = arith.addf %221, %222 : vector<8x64xf32>
    %224 = arith.negf %223 : vector<8x64xf32>
    %225 = math.exp %224 : vector<8x64xf32>
    %cst_54 = arith.constant 1.000000e+00 : f32
    %226 = vector.broadcast %cst_54 : f32 to vector<8x64xf32>
    %227 = arith.addf %226, %225 : vector<8x64xf32>
    %228 = arith.divf %226, %227 : vector<8x64xf32>
    %229 = vector.extract_strided_slice %228 {offsets = [0, 0], sizes = [8, 32], strides = [1, 1]} : vector<8x64xf32> to vector<8x32xf32>
    %230 = vector.extract_strided_slice %228 {offsets = [0, 32], sizes = [8, 32], strides = [1, 1]} : vector<8x64xf32> to vector<8x32xf32>
    %231 = vector.extract_strided_slice %215 {offsets = [0, 64], sizes = [8, 32], strides = [1, 1]} : vector<8x96xf32> to vector<8x32xf32>
    %232 = vector.extract_strided_slice %219 {offsets = [0, 64], sizes = [8, 32], strides = [1, 1]} : vector<8x96xf32> to vector<8x32xf32>
    %233 = arith.mulf %229, %232 : vector<8x32xf32>
    %234 = arith.addf %231, %233 : vector<8x32xf32>
    %235 = math.tanh %234 : vector<8x32xf32>
    %cst_55 = arith.constant 1.000000e+00 : f32
    %236 = vector.broadcast %cst_55 : f32 to vector<8x32xf32>
    %237 = arith.subf %236, %230 : vector<8x32xf32>
    %238 = arith.mulf %237, %235 : vector<8x32xf32>
    %239 = arith.mulf %230, %220 : vector<8x32xf32>
    %240 = arith.addf %238, %239 : vector<8x32xf32>
    %241 = vector.extract_strided_slice %218 {offsets = [0, 96], sizes = [8, 96], strides = [1, 1]} : vector<8x192xf32> to vector<8x96xf32>
    %242 = vector.extract_strided_slice %214 {offsets = [0, 32], sizes = [8, 32], strides = [1, 1]} : vector<8x64xf32> to vector<8x32xf32>
    %243 = vector.extract_strided_slice %216 {offsets = [0, 0], sizes = [8, 64], strides = [1, 1]} : vector<8x96xf32> to vector<8x64xf32>
    %244 = vector.extract_strided_slice %241 {offsets = [0, 0], sizes = [8, 64], strides = [1, 1]} : vector<8x96xf32> to vector<8x64xf32>
    %245 = arith.addf %243, %244 : vector<8x64xf32>
    %246 = arith.negf %245 : vector<8x64xf32>
    %247 = math.exp %246 : vector<8x64xf32>
    %cst_56 = arith.constant 1.000000e+00 : f32
    %248 = vector.broadcast %cst_56 : f32 to vector<8x64xf32>
    %249 = arith.addf %248, %247 : vector<8x64xf32>
    %250 = arith.divf %248, %249 : vector<8x64xf32>
    %251 = vector.extract_strided_slice %250 {offsets = [0, 0], sizes = [8, 32], strides = [1, 1]} : vector<8x64xf32> to vector<8x32xf32>
    %252 = vector.extract_strided_slice %250 {offsets = [0, 32], sizes = [8, 32], strides = [1, 1]} : vector<8x64xf32> to vector<8x32xf32>
    %253 = vector.extract_strided_slice %216 {offsets = [0, 64], sizes = [8, 32], strides = [1, 1]} : vector<8x96xf32> to vector<8x32xf32>
    %254 = vector.extract_strided_slice %241 {offsets = [0, 64], sizes = [8, 32], strides = [1, 1]} : vector<8x96xf32> to vector<8x32xf32>
    %255 = arith.mulf %251, %254 : vector<8x32xf32>
    %256 = arith.addf %253, %255 : vector<8x32xf32>
    %257 = math.tanh %256 : vector<8x32xf32>
    %cst_57 = arith.constant 1.000000e+00 : f32
    %258 = vector.broadcast %cst_57 : f32 to vector<8x32xf32>
    %259 = arith.subf %258, %252 : vector<8x32xf32>
    %260 = arith.mulf %259, %257 : vector<8x32xf32>
    %261 = arith.mulf %252, %242 : vector<8x32xf32>
    %262 = arith.addf %260, %261 : vector<8x32xf32>
    %263 = tpu.concatenate %240, %262 in 1 : vector<8x32xf32>, vector<8x32xf32> -> vector<8x64xf32>
    %c40_58 = arith.constant 40 : index
    %c0_59 = arith.constant 0 : index
    %264 = vector.load %arg11[%c40_58, %c0_59] : memref<64x96xf32, #tpu.memory_space<vmem>>, vector<8x96xf32>
    %c16_60 = arith.constant 16 : index
    %c0_61 = arith.constant 0 : index
    %265 = vector.load %arg12[%c16_60, %c0_61] : memref<64x96xf32, #tpu.memory_space<vmem>>, vector<8x96xf32>
    %cst_62 = arith.constant dense<0.000000e+00> : vector<8x192xf32>
    %266 = tpu.matmul %263, %14, %cst_62 {dimension_numbers = #tpu.dot_dimension_numbers<[1], [0], [0], [1], [0, 0, 1, 1], [], []>} : vector<8x64xf32>, vector<64x192xf32>, vector<8x192xf32> -> vector<8x192xf32>
    %267 = arith.addf %266, %17 : vector<8x192xf32>
    %268 = vector.extract_strided_slice %267 {offsets = [0, 0], sizes = [8, 96], strides = [1, 1]} : vector<8x192xf32> to vector<8x96xf32>
    %269 = vector.extract_strided_slice %263 {offsets = [0, 0], sizes = [8, 32], strides = [1, 1]} : vector<8x64xf32> to vector<8x32xf32>
    %270 = vector.extract_strided_slice %264 {offsets = [0, 0], sizes = [8, 64], strides = [1, 1]} : vector<8x96xf32> to vector<8x64xf32>
    %271 = vector.extract_strided_slice %268 {offsets = [0, 0], sizes = [8, 64], strides = [1, 1]} : vector<8x96xf32> to vector<8x64xf32>
    %272 = arith.addf %270, %271 : vector<8x64xf32>
    %273 = arith.negf %272 : vector<8x64xf32>
    %274 = math.exp %273 : vector<8x64xf32>
    %cst_63 = arith.constant 1.000000e+00 : f32
    %275 = vector.broadcast %cst_63 : f32 to vector<8x64xf32>
    %276 = arith.addf %275, %274 : vector<8x64xf32>
    %277 = arith.divf %275, %276 : vector<8x64xf32>
    %278 = vector.extract_strided_slice %277 {offsets = [0, 0], sizes = [8, 32], strides = [1, 1]} : vector<8x64xf32> to vector<8x32xf32>
    %279 = vector.extract_strided_slice %277 {offsets = [0, 32], sizes = [8, 32], strides = [1, 1]} : vector<8x64xf32> to vector<8x32xf32>
    %280 = vector.extract_strided_slice %264 {offsets = [0, 64], sizes = [8, 32], strides = [1, 1]} : vector<8x96xf32> to vector<8x32xf32>
    %281 = vector.extract_strided_slice %268 {offsets = [0, 64], sizes = [8, 32], strides = [1, 1]} : vector<8x96xf32> to vector<8x32xf32>
    %282 = arith.mulf %278, %281 : vector<8x32xf32>
    %283 = arith.addf %280, %282 : vector<8x32xf32>
    %284 = math.tanh %283 : vector<8x32xf32>
    %cst_64 = arith.constant 1.000000e+00 : f32
    %285 = vector.broadcast %cst_64 : f32 to vector<8x32xf32>
    %286 = arith.subf %285, %279 : vector<8x32xf32>
    %287 = arith.mulf %286, %284 : vector<8x32xf32>
    %288 = arith.mulf %279, %269 : vector<8x32xf32>
    %289 = arith.addf %287, %288 : vector<8x32xf32>
    %290 = vector.extract_strided_slice %267 {offsets = [0, 96], sizes = [8, 96], strides = [1, 1]} : vector<8x192xf32> to vector<8x96xf32>
    %291 = vector.extract_strided_slice %263 {offsets = [0, 32], sizes = [8, 32], strides = [1, 1]} : vector<8x64xf32> to vector<8x32xf32>
    %292 = vector.extract_strided_slice %265 {offsets = [0, 0], sizes = [8, 64], strides = [1, 1]} : vector<8x96xf32> to vector<8x64xf32>
    %293 = vector.extract_strided_slice %290 {offsets = [0, 0], sizes = [8, 64], strides = [1, 1]} : vector<8x96xf32> to vector<8x64xf32>
    %294 = arith.addf %292, %293 : vector<8x64xf32>
    %295 = arith.negf %294 : vector<8x64xf32>
    %296 = math.exp %295 : vector<8x64xf32>
    %cst_65 = arith.constant 1.000000e+00 : f32
    %297 = vector.broadcast %cst_65 : f32 to vector<8x64xf32>
    %298 = arith.addf %297, %296 : vector<8x64xf32>
    %299 = arith.divf %297, %298 : vector<8x64xf32>
    %300 = vector.extract_strided_slice %299 {offsets = [0, 0], sizes = [8, 32], strides = [1, 1]} : vector<8x64xf32> to vector<8x32xf32>
    %301 = vector.extract_strided_slice %299 {offsets = [0, 32], sizes = [8, 32], strides = [1, 1]} : vector<8x64xf32> to vector<8x32xf32>
    %302 = vector.extract_strided_slice %265 {offsets = [0, 64], sizes = [8, 32], strides = [1, 1]} : vector<8x96xf32> to vector<8x32xf32>
    %303 = vector.extract_strided_slice %290 {offsets = [0, 64], sizes = [8, 32], strides = [1, 1]} : vector<8x96xf32> to vector<8x32xf32>
    %304 = arith.mulf %300, %303 : vector<8x32xf32>
    %305 = arith.addf %302, %304 : vector<8x32xf32>
    %306 = math.tanh %305 : vector<8x32xf32>
    %cst_66 = arith.constant 1.000000e+00 : f32
    %307 = vector.broadcast %cst_66 : f32 to vector<8x32xf32>
    %308 = arith.subf %307, %301 : vector<8x32xf32>
    %309 = arith.mulf %308, %306 : vector<8x32xf32>
    %310 = arith.mulf %301, %291 : vector<8x32xf32>
    %311 = arith.addf %309, %310 : vector<8x32xf32>
    %312 = tpu.concatenate %289, %311 in 1 : vector<8x32xf32>, vector<8x32xf32> -> vector<8x64xf32>
    %c48_67 = arith.constant 48 : index
    %c0_68 = arith.constant 0 : index
    %313 = vector.load %arg11[%c48_67, %c0_68] : memref<64x96xf32, #tpu.memory_space<vmem>>, vector<8x96xf32>
    %c8_69 = arith.constant 8 : index
    %c0_70 = arith.constant 0 : index
    %314 = vector.load %arg12[%c8_69, %c0_70] : memref<64x96xf32, #tpu.memory_space<vmem>>, vector<8x96xf32>
    %cst_71 = arith.constant dense<0.000000e+00> : vector<8x192xf32>
    %315 = tpu.matmul %312, %14, %cst_71 {dimension_numbers = #tpu.dot_dimension_numbers<[1], [0], [0], [1], [0, 0, 1, 1], [], []>} : vector<8x64xf32>, vector<64x192xf32>, vector<8x192xf32> -> vector<8x192xf32>
    %316 = arith.addf %315, %17 : vector<8x192xf32>
    %317 = vector.extract_strided_slice %316 {offsets = [0, 0], sizes = [8, 96], strides = [1, 1]} : vector<8x192xf32> to vector<8x96xf32>
    %318 = vector.extract_strided_slice %312 {offsets = [0, 0], sizes = [8, 32], strides = [1, 1]} : vector<8x64xf32> to vector<8x32xf32>
    %319 = vector.extract_strided_slice %313 {offsets = [0, 0], sizes = [8, 64], strides = [1, 1]} : vector<8x96xf32> to vector<8x64xf32>
    %320 = vector.extract_strided_slice %317 {offsets = [0, 0], sizes = [8, 64], strides = [1, 1]} : vector<8x96xf32> to vector<8x64xf32>
    %321 = arith.addf %319, %320 : vector<8x64xf32>
    %322 = arith.negf %321 : vector<8x64xf32>
    %323 = math.exp %322 : vector<8x64xf32>
    %cst_72 = arith.constant 1.000000e+00 : f32
    %324 = vector.broadcast %cst_72 : f32 to vector<8x64xf32>
    %325 = arith.addf %324, %323 : vector<8x64xf32>
    %326 = arith.divf %324, %325 : vector<8x64xf32>
    %327 = vector.extract_strided_slice %326 {offsets = [0, 0], sizes = [8, 32], strides = [1, 1]} : vector<8x64xf32> to vector<8x32xf32>
    %328 = vector.extract_strided_slice %326 {offsets = [0, 32], sizes = [8, 32], strides = [1, 1]} : vector<8x64xf32> to vector<8x32xf32>
    %329 = vector.extract_strided_slice %313 {offsets = [0, 64], sizes = [8, 32], strides = [1, 1]} : vector<8x96xf32> to vector<8x32xf32>
    %330 = vector.extract_strided_slice %317 {offsets = [0, 64], sizes = [8, 32], strides = [1, 1]} : vector<8x96xf32> to vector<8x32xf32>
    %331 = arith.mulf %327, %330 : vector<8x32xf32>
    %332 = arith.addf %329, %331 : vector<8x32xf32>
    %333 = math.tanh %332 : vector<8x32xf32>
    %cst_73 = arith.constant 1.000000e+00 : f32
    %334 = vector.broadcast %cst_73 : f32 to vector<8x32xf32>
    %335 = arith.subf %334, %328 : vector<8x32xf32>
    %336 = arith.mulf %335, %333 : vector<8x32xf32>
    %337 = arith.mulf %328, %318 : vector<8x32xf32>
    %338 = arith.addf %336, %337 : vector<8x32xf32>
    %339 = vector.extract_strided_slice %316 {offsets = [0, 96], sizes = [8, 96], strides = [1, 1]} : vector<8x192xf32> to vector<8x96xf32>
    %340 = vector.extract_strided_slice %312 {offsets = [0, 32], sizes = [8, 32], strides = [1, 1]} : vector<8x64xf32> to vector<8x32xf32>
    %341 = vector.extract_strided_slice %314 {offsets = [0, 0], sizes = [8, 64], strides = [1, 1]} : vector<8x96xf32> to vector<8x64xf32>
    %342 = vector.extract_strided_slice %339 {offsets = [0, 0], sizes = [8, 64], strides = [1, 1]} : vector<8x96xf32> to vector<8x64xf32>
    %343 = arith.addf %341, %342 : vector<8x64xf32>
    %344 = arith.negf %343 : vector<8x64xf32>
    %345 = math.exp %344 : vector<8x64xf32>
    %cst_74 = arith.constant 1.000000e+00 : f32
    %346 = vector.broadcast %cst_74 : f32 to vector<8x64xf32>
    %347 = arith.addf %346, %345 : vector<8x64xf32>
    %348 = arith.divf %346, %347 : vector<8x64xf32>
    %349 = vector.extract_strided_slice %348 {offsets = [0, 0], sizes = [8, 32], strides = [1, 1]} : vector<8x64xf32> to vector<8x32xf32>
    %350 = vector.extract_strided_slice %348 {offsets = [0, 32], sizes = [8, 32], strides = [1, 1]} : vector<8x64xf32> to vector<8x32xf32>
    %351 = vector.extract_strided_slice %314 {offsets = [0, 64], sizes = [8, 32], strides = [1, 1]} : vector<8x96xf32> to vector<8x32xf32>
    %352 = vector.extract_strided_slice %339 {offsets = [0, 64], sizes = [8, 32], strides = [1, 1]} : vector<8x96xf32> to vector<8x32xf32>
    %353 = arith.mulf %349, %352 : vector<8x32xf32>
    %354 = arith.addf %351, %353 : vector<8x32xf32>
    %355 = math.tanh %354 : vector<8x32xf32>
    %cst_75 = arith.constant 1.000000e+00 : f32
    %356 = vector.broadcast %cst_75 : f32 to vector<8x32xf32>
    %357 = arith.subf %356, %350 : vector<8x32xf32>
    %358 = arith.mulf %357, %355 : vector<8x32xf32>
    %359 = arith.mulf %350, %340 : vector<8x32xf32>
    %360 = arith.addf %358, %359 : vector<8x32xf32>
    %361 = tpu.concatenate %338, %360 in 1 : vector<8x32xf32>, vector<8x32xf32> -> vector<8x64xf32>
    %c56_76 = arith.constant 56 : index
    %c0_77 = arith.constant 0 : index
    %362 = vector.load %arg11[%c56_76, %c0_77] : memref<64x96xf32, #tpu.memory_space<vmem>>, vector<8x96xf32>
    %c0_78 = arith.constant 0 : index
    %c0_79 = arith.constant 0 : index
    %363 = vector.load %arg12[%c0_78, %c0_79] : memref<64x96xf32, #tpu.memory_space<vmem>>, vector<8x96xf32>
    %cst_80 = arith.constant dense<0.000000e+00> : vector<8x192xf32>
    %364 = tpu.matmul %361, %14, %cst_80 {dimension_numbers = #tpu.dot_dimension_numbers<[1], [0], [0], [1], [0, 0, 1, 1], [], []>} : vector<8x64xf32>, vector<64x192xf32>, vector<8x192xf32> -> vector<8x192xf32>
    %365 = arith.addf %364, %17 : vector<8x192xf32>
    %366 = vector.extract_strided_slice %365 {offsets = [0, 0], sizes = [8, 96], strides = [1, 1]} : vector<8x192xf32> to vector<8x96xf32>
    %367 = vector.extract_strided_slice %361 {offsets = [0, 0], sizes = [8, 32], strides = [1, 1]} : vector<8x64xf32> to vector<8x32xf32>
    %368 = vector.extract_strided_slice %362 {offsets = [0, 0], sizes = [8, 64], strides = [1, 1]} : vector<8x96xf32> to vector<8x64xf32>
    %369 = vector.extract_strided_slice %366 {offsets = [0, 0], sizes = [8, 64], strides = [1, 1]} : vector<8x96xf32> to vector<8x64xf32>
    %370 = arith.addf %368, %369 : vector<8x64xf32>
    %371 = arith.negf %370 : vector<8x64xf32>
    %372 = math.exp %371 : vector<8x64xf32>
    %cst_81 = arith.constant 1.000000e+00 : f32
    %373 = vector.broadcast %cst_81 : f32 to vector<8x64xf32>
    %374 = arith.addf %373, %372 : vector<8x64xf32>
    %375 = arith.divf %373, %374 : vector<8x64xf32>
    %376 = vector.extract_strided_slice %375 {offsets = [0, 0], sizes = [8, 32], strides = [1, 1]} : vector<8x64xf32> to vector<8x32xf32>
    %377 = vector.extract_strided_slice %375 {offsets = [0, 32], sizes = [8, 32], strides = [1, 1]} : vector<8x64xf32> to vector<8x32xf32>
    %378 = vector.extract_strided_slice %362 {offsets = [0, 64], sizes = [8, 32], strides = [1, 1]} : vector<8x96xf32> to vector<8x32xf32>
    %379 = vector.extract_strided_slice %366 {offsets = [0, 64], sizes = [8, 32], strides = [1, 1]} : vector<8x96xf32> to vector<8x32xf32>
    %380 = arith.mulf %376, %379 : vector<8x32xf32>
    %381 = arith.addf %378, %380 : vector<8x32xf32>
    %382 = math.tanh %381 : vector<8x32xf32>
    %cst_82 = arith.constant 1.000000e+00 : f32
    %383 = vector.broadcast %cst_82 : f32 to vector<8x32xf32>
    %384 = arith.subf %383, %377 : vector<8x32xf32>
    %385 = arith.mulf %384, %382 : vector<8x32xf32>
    %386 = arith.mulf %377, %367 : vector<8x32xf32>
    %387 = arith.addf %385, %386 : vector<8x32xf32>
    %388 = vector.extract_strided_slice %365 {offsets = [0, 96], sizes = [8, 96], strides = [1, 1]} : vector<8x192xf32> to vector<8x96xf32>
    %389 = vector.extract_strided_slice %361 {offsets = [0, 32], sizes = [8, 32], strides = [1, 1]} : vector<8x64xf32> to vector<8x32xf32>
    %390 = vector.extract_strided_slice %363 {offsets = [0, 0], sizes = [8, 64], strides = [1, 1]} : vector<8x96xf32> to vector<8x64xf32>
    %391 = vector.extract_strided_slice %388 {offsets = [0, 0], sizes = [8, 64], strides = [1, 1]} : vector<8x96xf32> to vector<8x64xf32>
    %392 = arith.addf %390, %391 : vector<8x64xf32>
    %393 = arith.negf %392 : vector<8x64xf32>
    %394 = math.exp %393 : vector<8x64xf32>
    %cst_83 = arith.constant 1.000000e+00 : f32
    %395 = vector.broadcast %cst_83 : f32 to vector<8x64xf32>
    %396 = arith.addf %395, %394 : vector<8x64xf32>
    %397 = arith.divf %395, %396 : vector<8x64xf32>
    %398 = vector.extract_strided_slice %397 {offsets = [0, 0], sizes = [8, 32], strides = [1, 1]} : vector<8x64xf32> to vector<8x32xf32>
    %399 = vector.extract_strided_slice %397 {offsets = [0, 32], sizes = [8, 32], strides = [1, 1]} : vector<8x64xf32> to vector<8x32xf32>
    %400 = vector.extract_strided_slice %363 {offsets = [0, 64], sizes = [8, 32], strides = [1, 1]} : vector<8x96xf32> to vector<8x32xf32>
    %401 = vector.extract_strided_slice %388 {offsets = [0, 64], sizes = [8, 32], strides = [1, 1]} : vector<8x96xf32> to vector<8x32xf32>
    %402 = arith.mulf %398, %401 : vector<8x32xf32>
    %403 = arith.addf %400, %402 : vector<8x32xf32>
    %404 = math.tanh %403 : vector<8x32xf32>
    %cst_84 = arith.constant 1.000000e+00 : f32
    %405 = vector.broadcast %cst_84 : f32 to vector<8x32xf32>
    %406 = arith.subf %405, %399 : vector<8x32xf32>
    %407 = arith.mulf %406, %404 : vector<8x32xf32>
    %408 = arith.mulf %399, %389 : vector<8x32xf32>
    %409 = arith.addf %407, %408 : vector<8x32xf32>
    %410 = tpu.concatenate %387, %409 in 1 : vector<8x32xf32>, vector<8x32xf32> -> vector<8x64xf32>
    %c0_85 = arith.constant 0 : index
    %c0_86 = arith.constant 0 : index
    %411 = vector.load %arg8[%c0_85, %c0_86] : memref<64x8xf32, #tpu.memory_space<vmem>>, vector<64x8xf32>
    %cst_87 = arith.constant dense<0.000000e+00> : vector<8x8xf32>
    %412 = tpu.matmul %410, %411, %cst_87 {dimension_numbers = #tpu.dot_dimension_numbers<[1], [0], [0], [1], [0, 0, 1, 1], [], []>} : vector<8x64xf32>, vector<64x8xf32>, vector<8x8xf32> -> vector<8x8xf32>
    %c0_88 = arith.constant 0 : index
    %c0_89 = arith.constant 0 : index
    %413 = vector.load %arg9[%c0_88, %c0_89] : memref<1x8xf32, #tpu.memory_space<vmem>>, vector<1x8xf32>
    %414 = vector.broadcast %413 : vector<1x8xf32> to vector<8x8xf32>
    %415 = arith.addf %412, %414 : vector<8x8xf32>
    %cst_90 = arith.constant dense<0xFF800000> : vector<8xf32>
    %416 = vector.multi_reduction <maximumf>, %415, %cst_90 [1] : vector<8x8xf32> to vector<8xf32>
    %417 = vector.shape_cast %416 : vector<8xf32> to vector<8x1xf32>
    %418 = vector.broadcast %417 : vector<8x1xf32> to vector<8x8xf32>
    %419 = arith.subf %415, %418 : vector<8x8xf32>
    %420 = math.exp %419 : vector<8x8xf32>
    %cst_91 = arith.constant dense<0.000000e+00> : vector<8xf32>
    %421 = vector.multi_reduction <add>, %420, %cst_91 [1] : vector<8x8xf32> to vector<8xf32>
    %422 = vector.shape_cast %421 : vector<8xf32> to vector<8x1xf32>
    %423 = tpu.reciprocal %422 {approx = true} : vector<8x1xf32> -> vector<8x1xf32>
    %424 = vector.broadcast %423 : vector<8x1xf32> to vector<8x8xf32>
    %425 = arith.mulf %420, %424 : vector<8x8xf32>
    %cst_92 = arith.constant 0.000000e+00 : f32
    %426 = vector.broadcast %cst_92 : f32 to vector<8x48xf32>
    %427 = tpu.concatenate %410, %415, %425, %426 in 1 : vector<8x64xf32>, vector<8x8xf32>, vector<8x8xf32>, vector<8x48xf32> -> vector<8x128xf32>
    %c0_93 = arith.constant 0 : index
    %c0_94 = arith.constant 0 : index
    %428 = vector.load %arg10[%c0_93, %c0_94] : memref<8x128xf32, #tpu.memory_space<vmem>>, vector<8x128xf32>
    tpu.vector_store %arg10[%c0_93, %c0_94], %427 {strides = array<i32>} : memref<8x128xf32, #tpu.memory_space<vmem>>, vector<8x128xf32>,
    return
  }
  func.func @transform_0(%arg0: i32) -> (i32, i32, i32) {
    %c0_i32 = arith.constant 0 : i32
    %c0_i32_0 = arith.constant 0 : i32
    %c0_i32_1 = arith.constant 0 : i32
    return %c0_i32, %arg0, %c0_i32_0 : i32, i32, i32
  }
  func.func @transform_1(%arg0: i32) -> (i32, i32) {
    %c0_i32 = arith.constant 0 : i32
    %c0_i32_0 = arith.constant 0 : i32
    %c0_i32_1 = arith.constant 0 : i32
    return %c0_i32, %c0_i32_0 : i32, i32
  }
  func.func @transform_2(%arg0: i32) -> (i32, i32) {
    %c0_i32 = arith.constant 0 : i32
    %c0_i32_0 = arith.constant 0 : i32
    %c0_i32_1 = arith.constant 0 : i32
    return %c0_i32, %c0_i32_0 : i32, i32
  }
  func.func @transform_3(%arg0: i32) -> (i32, i32) {
    %c0_i32 = arith.constant 0 : i32
    %c0_i32_0 = arith.constant 0 : i32
    %c0_i32_1 = arith.constant 0 : i32
    return %c0_i32, %c0_i32_0 : i32, i32
  }
  func.func @transform_4(%arg0: i32) -> (i32, i32) {
    %c0_i32 = arith.constant 0 : i32
    %c0_i32_0 = arith.constant 0 : i32
    %c0_i32_1 = arith.constant 0 : i32
    return %c0_i32, %c0_i32_0 : i32, i32
  }
  func.func @transform_5(%arg0: i32) -> (i32, i32) {
    %c0_i32 = arith.constant 0 : i32
    %c0_i32_0 = arith.constant 0 : i32
    %c0_i32_1 = arith.constant 0 : i32
    return %c0_i32, %c0_i32_0 : i32, i32
  }
  func.func @transform_6(%arg0: i32) -> (i32, i32) {
    %c0_i32 = arith.constant 0 : i32
    %c0_i32_0 = arith.constant 0 : i32
    %c0_i32_1 = arith.constant 0 : i32
    return %c0_i32, %c0_i32_0 : i32, i32
  }
  func.func @transform_7(%arg0: i32) -> (i32, i32) {
    %c0_i32 = arith.constant 0 : i32
    %c0_i32_0 = arith.constant 0 : i32
    %c0_i32_1 = arith.constant 0 : i32
    return %c0_i32, %c0_i32_0 : i32, i32
  }
  func.func @transform_8(%arg0: i32) -> (i32, i32) {
    %c0_i32 = arith.constant 0 : i32
    %c0_i32_0 = arith.constant 0 : i32
    %c0_i32_1 = arith.constant 0 : i32
    return %c0_i32, %c0_i32_0 : i32, i32
  }
  func.func @transform_9(%arg0: i32) -> (i32, i32) {
    %c0_i32 = arith.constant 0 : i32
    %c0_i32_0 = arith.constant 0 : i32
    return %arg0, %c0_i32 : i32, i32
  }
}

</mosaic_0001>

<bundles_post_ra>
// kernel: tpu_custom_call.1
= control target key start
LH: loop header
LB: loop body
LE: loop exit
PB: predicated region body
PF: predicated region fallthrough
CT: control target
= control target key end

     0   :  { %14 = vsyncpa [#allocation5], 0  ;;  %s2605_s0 = inlined_call_operand.vmem [shape: f32[8,8,32], index: 0, kind: input, shape index: {}]   ;;  %s2606_s1 = inlined_call_operand.hbm [shape: f32[32,96], index: 1, kind: input, shape index: {}]   ;;  %s2607_s2 = inlined_call_operand.vmem [shape: f32[1,96], index: 2, kind: input, shape index: {}]   ;;  %s2608_s3 = inlined_call_operand.hbm [shape: f32[32,96], index: 3, kind: input, shape index: {}]   ;;  %s2609_s4 = inlined_call_operand.vmem [shape: f32[1,96], index: 4, kind: input, shape index: {}]   ;;  %s2610_s5 = inlined_call_operand.hbm [shape: f32[64,192], index: 5, kind: input, shape index: {}]   ;;  %s2611_s6 = inlined_call_operand.vmem [shape: f32[1,192], index: 6, kind: input, shape index: {}]   ;;  %s2612_s7 = inlined_call_operand.vmem [shape: f32[64,8], index: 7, kind: input, shape index: {}]   ;;  %s2613_s8 = inlined_call_operand.vmem [shape: f32[1,8], index: 8, kind: input, shape index: {}]   ;;  %s2614_s9 = inlined_call_operand.hbm [shape: f32[8,128], index: 9, kind: output, shape index: {}]  }
   0x1   :  { %15 = vsyncpa [#allocation8], 0 }
   0x2   :  { %16 = vsyncpa [#allocation6], 0  ;;  %s2148_s30 = smov [#allocation7]   ;;  %s2149_s11 = smov [#allocation4]  }
   0x3   :  { %s38_s10 = sshll.u32 %s2148_s30, 4  ;;  %s24_s12 = sshll.u32 %s2149_s11, 4  ;;  %s39_s10 = int_to_ptr.vmem [resolvable:$true] %s38_s10  ;;  %s2213_s12 = int_to_ptr.vmem [resolvable:$true] %s24_s12 }
   0x4   :  { %s2054_s15 = scalar_lea.hbm %s2608_s3, 512 }
   0x5   :  { %p2055_p0 = scmp.ne.s32.totalorder %s2608_s3, %s2054_s15  ;;  %p2058_p1 = scmp.lt.u32.totalorder %s2054_s15, %s2608_s3 }
   0x7   :  { %p2060_p2 = pnand %p2058_p1, %p2055_p0 }
   0x9   :  { %2063 = shalt.err (!%p2060_p2)
}
   0xa   :  { %s2064_s20 = scalar_lea.vmem %s39_s10, 512  ;;  %p2069_p4 = scmp.lt.s32.totalorder %s39_s10, %s39_s10 }
   0xb   :  { %p2065_p3 = scmp.ne.s32.totalorder %s39_s10, %s2064_s20  ;;  %p2070_p5 = scmp.lt.s32.totalorder %s2064_s20, %s2064_s20 }
   0xd   :  { %p2071_p6 = por %p2070_p5, %p2069_p4 }
   0xf   :  { %p2072_p7 = pnand %p2071_p6, %p2065_p3 }
  0x11   :  { %2075 = shalt.err (!%p2072_p7)
}
  0x12   :  { %s2150_s21 = smov 128   ;;  %s2151_s22 = smov 8  }
  0x13   :  { %44 = dma.hbm_to_vmem [thread:$0]  %s2608_s3, 512, %s39_s10, [#allocation8], %s2150_s21, %s2150_s21, %s2151_s22  }
  0x14   :  { %s2076_s27 = scalar_lea.hbm %s2606_s1, 512 }
  0x15   :  { %p2077_p8 = scmp.ne.s32.totalorder %s2606_s1, %s2076_s27  ;;  %p2080_p9 = scmp.lt.u32.totalorder %s2076_s27, %s2606_s1 }
  0x17   :  { %p2082_p10 = pnand %p2080_p9, %p2077_p8 }
  0x19   :  { %2085 = shalt.err (!%p2082_p10)
}
  0x1a   :  { %s2086_s13 = scalar_lea.vmem %s2213_s12, 512  ;;  %p2091_p12 = scmp.lt.s32.totalorder %s2213_s12, %s2213_s12 }
  0x1b   :  { %p2087_p11 = scmp.ne.s32.totalorder %s2213_s12, %s2086_s13  ;;  %p2092_p13 = scmp.lt.s32.totalorder %s2086_s13, %s2086_s13 }
  0x1d   :  { %p2093_p0 = por %p2092_p13, %p2091_p12 }
  0x1f   :  { %p2094_p1 = pnand %p2093_p0, %p2087_p11 }
  0x21   :  { %2097 = shalt.err (!%p2094_p1)
}
  0x22   :  { %30 = dma.hbm_to_vmem [thread:$0]  %s2606_s1, 512, %s2213_s12, [#allocation5], %s2150_s21, %s2150_s21, %s2151_s22  }
  0x23   :  { %s2152_s14 = smov [#allocation9]   ;;  %s2098_s18 = scalar_lea.hbm %s2610_s5, 2048 }
  0x24   :  { %s52_s15 = sshll.u32 %s2152_s14, 4  ;;  %p2099_p2 = scmp.ne.s32.totalorder %s2610_s5, %s2098_s18  ;;  %s53_s15 = int_to_ptr.vmem [resolvable:$true] %s52_s15 }
  0x25   :  { %p2102_p3 = scmp.lt.u32.totalorder %s2098_s18, %s2610_s5 }
  0x27   :  { %p2104_p4 = pnand %p2102_p3, %p2099_p2 }
  0x29   :  { %2107 = shalt.err (!%p2104_p4)
}
  0x2a   :  { %s2108_s25 = scalar_lea.vmem %s53_s15, 2048  ;;  %p2113_p6 = scmp.lt.s32.totalorder %s53_s15, %s53_s15 }
  0x2b   :  { %p2109_p5 = scmp.ne.s32.totalorder %s53_s15, %s2108_s25  ;;  %p2114_p7 = scmp.lt.s32.totalorder %s2108_s25, %s2108_s25 }
  0x2d   :  { %p2115_p8 = por %p2114_p7, %p2113_p6 }
  0x2f   :  { %p2116_p9 = pnand %p2115_p8, %p2109_p5 }
  0x31   :  { %2119 = shalt.err (!%p2116_p9)
}
  0x32   :  { %s2153_s1 = smov 256   ;;  %s2154_s12 = smov 16  }
  0x33   :  { %58 = dma.hbm_to_vmem [thread:$0]  %s2610_s5, 2048, %s53_s15, [#allocation8], %s2153_s1, %s2153_s1, %s2154_s12  }
  0x34   :  { %2142 = dma.done.wait [#allocation5], 512  }
  0x35   :  { %2143 = vsyncadd [#allocation5], 4294966784 }
  0x36   :  { %2144 = dma.done.wait [#allocation8], 2560  }
  0x37   :  { %2145 = vsyncadd [#allocation8], 4294964736  ;;  %vm93_vm0 = vcmask 261120   ;;  %v82_v0 = vld [vmem:[#allocation4] sm:$0xff]  ;;  %v83_v1 = vld [vmem:[#allocation4 + $0x8] sm:$0xff]  ;;  %v2155_v44 = vmov 0.0   ;;  %v374_v49 = vlaneseq }
  0x38   :  { %v84_v2 = vld [vmem:[#allocation4 + $0x10] sm:$0xff]  ;;  %v1783_v3 = vpack.c.bf16 %v83_v1, %v82_v0  ;;  %v85_v4 = vld [vmem:[#allocation4 + $0x18] sm:$0xff]  ;;  %v74_v5 = vld [vmem:[%s2605_s0] sm:$0xff]  ;;  %vm223_vm1 = vcmask 785408   ;;  %s2158_s1 = smov 96   ;;  %vm386_vm2 = vcmask 523264  }
  0x39   :  { %v1787_v6 = vpack.c.bf16 %v85_v4, %v84_v2  ;;  %1732 = vmatprep.mubr.msk.f32.mxu0 %vm93_vm0, %v74_v5  ;;  %v357_v7 = vld [vmem:[#allocation9 + $0x8] sm:$0xff]  ;;  %v359_v8 = vld [vmem:[#allocation9 + $0x18] sm:$0xff]  ;;  %1752 = vmatprep.mubr.msk.f32.mxu1 %vm93_vm0, %v74_v5  ;;  %v356_v10 = vld [vmem:[#allocation9] sm:$0xff]  ;;  %v375_v54 = vshrl.u32 %v374_v49, 7  ;;  %vm2160_vm3 = vmmov 0   ;;  %vm1606_vm4 = vcmask 64512  }
  0x3a   :  { %1784 = vmatprep.subr.bf16.mxu0 %v1783_v3  ;;  %v2261_v9 = vpack.c.bf16 %v359_v8, %v357_v7  ;;  %v358_v11 = vld [vmem:[#allocation9 + $0x10] sm:$0xff]  ;;  %v361_v12 = vld [vmem:[#allocation9 + $0x28] sm:$0xff]  ;;  %v363_v13 = vld [vmem:[#allocation9 + $0x38] sm:$0xff]  ;;  %vm1627_vm5 = vcmask 588800   ;;  %s2162_s18 = smov [#allocation10]   ;;  %vm1629_vm6 = vcmask 654336  }
  0x3b   :  { %1786 = vmatpush3.bf16.msra.mxu0 %v1783_v3  ;;  %v75_v14 = vld [vmem:[%s2605_s0 + $0x8] sm:$0xff]  ;;  %v2266_v15 = vpack.c.bf16 %v358_v11, %v356_v10  ;;  %v76_v16 = vld [vmem:[%s2605_s0 + $0x10] sm:$0xff]  ;;  %v360_v17 = vld [vmem:[#allocation9 + $0x20] sm:$0xff]  ;;  %v2272_v19 = vpack.c.bf16 %v363_v13, %v361_v12  ;;  %v376_v59 = vsub.s32 0, %v375_v54  ;;  %v380_v62 = vsub.s32 1, %v375_v54  ;;  %s1638_s19 = sshll.u32 %s2162_s18, 4  ;;  %s1639_s19 = int_to_ptr.vmem [resolvable:$true] %s1638_s19 }
  0x3c   :  { %1788 = vmatprep.subr.bf16.mxu0 %v1787_v6  ;;  %v362_v18 = vld [vmem:[#allocation9 + $0x30] sm:$0xff]  ;;  %v365_v20 = vld [vmem:[#allocation9 + $0x48] sm:$0xff]  ;;  %v232_v21 = vld [vmem:[#allocation7] sm:$0xff]  ;;  %p2125_p11 = scmp.lt.s32.totalorder %s1639_s19, %s1639_s19 }
  0x3d   :  { %v233_v22 = vld [vmem:[#allocation7 + $0x8] sm:$0xff]  ;;  %v367_v23 = vld [vmem:[#allocation9 + $0x58] sm:$0xff]  ;;  %v234_v25 = vld [vmem:[#allocation7 + $0x10] sm:$0xff]  ;;  %v2280_v29 = vpack.c.bf16 %v362_v18, %v360_v17 }
  0x3e   :  { %v1791_v24 = vpack.c.bf16 %v233_v22, %v232_v21  ;;  %v235_v26 = vld [vmem:[#allocation7 + $0x18] sm:$0xff]  ;;  %v78_v30 = vld [vmem:[%s2605_s0 + $0x20] sm:$0xff]  ;;  %v2286_v31 = vpack.c.bf16 %v367_v23, %v365_v20  ;;  %v366_v33 = vld [vmem:[#allocation9 + $0x50] sm:$0xff] }
  0x3f   :  { %1790 = vmatpush3.bf16.msra.mxu0 %v1787_v6  ;;  %v1795_v27 = vpack.c.bf16 %v235_v26, %v234_v25  ;;  %v77_v28 = vld [vmem:[%s2605_s0 + $0x18] sm:$0xff]  ;;  %v364_v32 = vld [vmem:[#allocation9 + $0x40] sm:$0xff]  ;;  %v369_v34 = vld [vmem:[#allocation9 + $0x68] sm:$0xff] }
  0x40   :  { %1800 = vmatprep.subr.bf16.mxu0 %v2261_v9  ;;  %1792 = vmatprep.subr.bf16.mxu1 %v1791_v24  ;;  %v371_v35 = vld [vmem:[#allocation9 + $0x78] sm:$0xff]  ;;  %v79_v36 = vld [vmem:[%s2605_s0 + $0x28] sm:$0xff]  ;;  %v2294_v37 = vpack.c.bf16 %v366_v33, %v364_v32  ;;  %v80_v38 = vld [vmem:[%s2605_s0 + $0x30] sm:$0xff] }
  0x41   :  { %1794 = vmatpush3.bf16.msra.mxu1 %v1791_v24  ;;  %v2300_v39 = vpack.c.bf16 %v371_v35, %v369_v34  ;;  %v368_v40 = vld [vmem:[#allocation9 + $0x60] sm:$0xff]  ;;  %v370_v41 = vld [vmem:[#allocation9 + $0x70] sm:$0xff]  ;;  %v81_v42 = vld [vmem:[%s2605_s0 + $0x38] sm:$0xff]  ;;  %s2120_s0 = scalar_lea.vmem %s1639_s19, 128 }
  0x42   :  { %1733 = vmatmul.mubr.msk.f32.vlgmr.msra.gmra.mrb[0].mxu0 %vm93_vm0, %v75_v14  ;;  %1796 = vmatprep.subr.bf16.mxu1 %v1795_v27  ;;  %v2309_v43 = vpack.c.bf16 %v370_v41, %v368_v40  ;;  %v1648_v45 = vld [vmem:[%s2607_s2] ss:$0 sm:$0xff]  ;;  %p2121_p10 = scmp.ne.s32.totalorder %s1639_s19, %s2120_s0  ;;  %p2126_p12 = scmp.lt.s32.totalorder %s2120_s0, %s2120_s0 }
  0x43   :  { %1802 = vmatpush1.bf16.msra.mxu0 %v2266_v15  ;;  %1735 = vmatprep.mubr.msk.f32.mxu0 %vm93_vm0, %v76_v16  ;;  %v372_v61 = vld [vmem:[%s2611_s6] sm:$0x3]  ;;  %s2157_s6 = smov 32  }
  0x44   :  { %1804 = vmatprep.subr.bf16.mxu0 %v2272_v19  ;;  %v1657_v0 = vld [vmem:[%s2609_s4] ss:$0 sm:$0xff]  ;;  %v2357_v7 = vrot.slane %v372_v61, %v376_v59  ;;  %v2360_v10 = vrot.slane %v372_v61, %v380_v62  ;;  %s2156_s4 = smov 64   ;;  %p2127_p13 = por %p2126_p12, %p2125_p11 }
  0x45   :  { %1798 = vmatpush3.bf16.msra.mxu1 %v1795_v27 }
  0x46   :  { %1736 = vmatmul.mubr.msk.f32.gmra.mrb[2].mxu0 %vm93_vm0, %v77_v28  ;;  %1816 = vmatprep.subr.bf16.mxu1 %v2261_v9  ;;  %p2128_p0 = pnand %p2127_p13, %p2121_p10 }
  0x47   :  { %1806 = vmatpush1.bf16.msra.mxu0 %v2280_v29  ;;  %1738 = vmatprep.mubr.msk.f32.mxu0 %vm93_vm0, %v78_v30 }
  0x48   :  { %1808 = vmatprep.subr.bf16.mxu0 %v2286_v31  ;;  %1753 = vmatmul.mubr.msk.f32.vlgmr.msra.gmra.mrb[0].mxu1 %vm93_vm0, %v75_v14 }
  0x49   :  { %1755 = vmatprep.mubr.msk.f32.mxu1 %vm93_vm0, %v76_v16  ;;  %1818 = vmatpush1.bf16.msra.mxu1 %v2266_v15 }
  0x4a   :  { %1739 = vmatmul.mubr.msk.f32.gmra.mrb[4].mxu0 %vm93_vm0, %v79_v36  ;;  %1820 = vmatprep.subr.bf16.mxu1 %v2272_v19 }
  0x4b   :  { %1810 = vmatpush1.bf16.msra.mxu0 %v2294_v37  ;;  %1741 = vmatprep.mubr.msk.f32.mxu0 %vm93_vm0, %v80_v38 }
  0x4c   :  { %1812 = vmatprep.subr.bf16.mxu0 %v2300_v39  ;;  %1756 = vmatmul.mubr.msk.f32.gmra.mrb[2].mxu1 %vm93_vm0, %v77_v28 }
  0x4d   :  { %1758 = vmatprep.mubr.msk.f32.mxu1 %vm93_vm0, %v78_v30  ;;  %1822 = vmatpush1.bf16.msra.mxu1 %v2280_v29 }
  0x4e   :  { %1742 = vmatmul.mubr.msk.f32.gmra.mrb[6].mxu0 %vm93_vm0, %v81_v42  ;;  %1824 = vmatprep.subr.bf16.mxu1 %v2286_v31 }
  0x4f   :  { %1814 = vmatpush1.bf16.msra.mxu0 %v2309_v43  ;;  %454 = vmatprep.mubr.f32.mxu0 %v2155_v44 }
  0x50   :  { %1832 = vmatprep.subr.bf16.mxu0 %v2261_v9  ;;  %1759 = vmatmul.mubr.msk.f32.gmra.mrb[4].mxu1 %vm93_vm0, %v79_v36 }
  0x51   :  { %1761 = vmatprep.mubr.msk.f32.mxu1 %vm93_vm0, %v80_v38  ;;  %1826 = vmatpush1.bf16.msra.mxu1 %v2294_v37 }
  0x52   :  { %455 = vmatmul.mubr.f32.vlgmr.msra.gmra.mrb[8].mxu0 %v2155_v44  ;;  %1828 = vmatprep.subr.bf16.mxu1 %v2300_v39 }
  0x53   :  { %1834 = vmatpush1.bf16.msra.mxu0 %v2266_v15  ;;  %735 = vmatprep.mubr.f32.mxu0 %v2155_v44 }
  0x54   :  { %1836 = vmatprep.subr.bf16.mxu0 %v2272_v19  ;;  %1762 = vmatmul.mubr.msk.f32.gmra.mrb[6].mxu1 %vm93_vm0, %v81_v42 }
  0x55   :  { %1830 = vmatpush1.bf16.msra.mxu1 %v2309_v43  ;;  %593 = vmatprep.mubr.f32.mxu1 %v2155_v44 }
  0x56   :  { %1848 = vmatprep.subr.bf16.mxu1 %v2261_v9 }
  0x57   :  { %1838 = vmatpush1.bf16.msra.mxu0 %v2280_v29 }
  0x58   :  { %1840 = vmatprep.subr.bf16.mxu0 %v2286_v31 }
  0x5b   :  { %1842 = vmatpush1.bf16.msra.mxu0 %v2294_v37 }
  0x5c   :  { %1844 = vmatprep.subr.bf16.mxu0 %v2300_v39 }
  0x5f   :  { %1846 = vmatpush1.bf16.msra.mxu0 %v2309_v43 }
  0x60   :  { %1864 = vmatprep.subr.bf16.mxu0 %v2261_v9 }
 0x115   :  { %v1734_v46 = vpop.f32.mrb[0].mxu0 }
 0x116   :  { %v190_v47 = vadd.f32 %v1734_v46, %v1648_v45  ;;  %v184_v48 = vpop.f32.mrb[1].mxu0 }
 0x117   :  { %v185_v50 = vadd.f32 %v1648_v45, %v184_v48 }
 0x118   :  { %225 = vst.msk [vmem:[#allocation2 + $0x8] sm:$0xff] %vm223_vm1, %v190_v47 }
 0x119   :  { %224 = vst.msk [vmem:[#allocation2] sm:$0xff] %vm223_vm1, %v185_v50  ;;  %v1737_v51 = vpop.f32.mrb[2].mxu0 }
 0x11a   :  { %v200_v52 = vadd.f32 %v1737_v51, %v1648_v45  ;;  %v194_v53 = vpop.f32.mrb[3].mxu0 }
 0x11b   :  { %v195_v55 = vadd.f32 %v1648_v45, %v194_v53  ;;  %v1754_v63 = vpop.f32.mrb[0].mxu1 }
 0x11c   :  { %227 = vst.msk [vmem:[#allocation2 + $0x18] sm:$0xff] %vm223_vm1, %v200_v52  ;;  %v315_v1 = vadd.f32 %v1754_v63, %v1657_v0  ;;  %v309_v2 = vpop.f32.mrb[1].mxu1 }
 0x11d   :  { %226 = vst.msk [vmem:[#allocation2 + $0x10] sm:$0xff] %vm223_vm1, %v195_v55  ;;  %v1740_v56 = vpop.f32.mrb[4].mxu0  ;;  %v310_v4 = vadd.f32 %v1657_v0, %v309_v2 }
 0x11e   :  { %v210_v57 = vadd.f32 %v1740_v56, %v1648_v45  ;;  %v204_v58 = vpop.f32.mrb[5].mxu0  ;;  %349 = vst.msk [vmem:[#allocation3 + $0x8] sm:$0xff] %vm223_vm1, %v315_v1 }
 0x11f   :  { %v205_v60 = vadd.f32 %v1648_v45, %v204_v58  ;;  %348 = vst.msk [vmem:[#allocation3] sm:$0xff] %vm223_vm1, %v310_v4  ;;  %v1757_v11 = vpop.f32.mrb[2].mxu1 }
 0x120   :  { %229 = vst.msk [vmem:[#allocation2 + $0x28] sm:$0xff] %vm223_vm1, %v210_v57  ;;  %v325_v12 = vadd.f32 %v1757_v11, %v1657_v0  ;;  %v319_v13 = vpop.f32.mrb[3].mxu1  ;;  %v384_v30 = vld [vmem:[#allocation2] sm:$0xff] }
 0x121   :  { %228 = vst.msk [vmem:[#allocation2 + $0x20] sm:$0xff] %vm223_vm1, %v205_v60  ;;  %v1743_v3 = vpop.f32.mrb[6].mxu0  ;;  %v320_v16 = vadd.f32 %v1657_v0, %v319_v13 }
 0x122   :  { %v220_v5 = vadd.f32 %v1743_v3, %v1648_v45  ;;  %v214_v6 = vpop.f32.mrb[7].mxu0  ;;  %351 = vst.msk [vmem:[#allocation3 + $0x18] sm:$0xff] %vm223_vm1, %v325_v12 }
 0x123   :  { %v215_v8 = vadd.f32 %v1648_v45, %v214_v6  ;;  %350 = vst.msk [vmem:[#allocation3 + $0x10] sm:$0xff] %vm223_vm1, %v320_v16  ;;  %v1760_v21 = vpop.f32.mrb[4].mxu1  ;;  %v524_v16 = vld [vmem:[#allocation2 + $0x8] sm:$0xff] }
 0x124   :  { %231 = vst.msk [vmem:[#allocation2 + $0x38] sm:$0xff] %vm223_vm1, %v220_v5  ;;  %v335_v22 = vadd.f32 %v1760_v21, %v1657_v0  ;;  %v329_v23 = vpop.f32.mrb[5].mxu1 }
 0x125   :  { %230 = vst.msk [vmem:[#allocation2 + $0x30] sm:$0xff] %vm223_vm1, %v215_v8  ;;  %v456_v14 = vpop.f32.mrb[8].mxu0  ;;  %v330_v24 = vadd.f32 %v1657_v0, %v329_v23 }
 0x126   :  { %v457_v17 = vadd.f32 %v456_v14, %v2357_v7  ;;  %v458_v18 = vpop.f32.mrb[9].mxu0  ;;  %353 = vst.msk [vmem:[#allocation3 + $0x28] sm:$0xff] %vm223_vm1, %v335_v22 }
 0x127   :  { %v459_v20 = vadd.f32 %v458_v18, %v2360_v10  ;;  %352 = vst.msk [vmem:[#allocation3 + $0x20] sm:$0xff] %vm223_vm1, %v330_v24  ;;  %v1763_v25 = vpop.f32.mrb[6].mxu1 }
 0x128   :  { %469 = vrot.lane.b32.xlu0 %v457_v17, %s2156_s4  ;;  %v345_v26 = vadd.f32 %v1763_v25, %v1657_v0  ;;  %v339_v27 = vpop.f32.mrb[7].mxu1  ;;  %v461_v32 = vadd.f32 %v457_v17, %v384_v30 }
 0x129   :  { %490 = vrot.lane.b32.xlu1 %v459_v20, %s2157_s6  ;;  %v340_v28 = vadd.f32 %v1657_v0, %v339_v27 }
 0x12a   :  { %355 = vst.msk [vmem:[#allocation3 + $0x38] sm:$0xff] %vm223_vm1, %v345_v26  ;;  %v1666_v33 = vmul.f32 -1.442695, %v461_v32 }
 0x12b   :  { %354 = vst.msk [vmem:[#allocation3 + $0x30] sm:$0xff] %vm223_vm1, %v340_v28 }
 0x12c   :  { %488 = vrot.lane.b32.xlu0 %v457_v17, %s2157_s6  ;;  %1954 = vpow2.f32 %v1666_v33 }
 0x12d   :  { %501 = vrot.lane.b32.xlu1 %v459_v20, %s2158_s1 }
 0x131   :  { %v385_v41 = vld [vmem:[#allocation3 + $0x38] sm:$0xff] }
 0x132   :  { %v525_v27 = vld [vmem:[#allocation3 + $0x30] sm:$0xff] }
 0x136   :  { %v1955_v34 = vpop.eup %1954 }
 0x137   :  { %v465_v35 = vadd.f32 1.0, %v1955_v34 }
 0x139   :  { %1956 = vrcp.f32 %v465_v35 }
 0x143   :  { %v1957_v36 = vpop.eup %1956 }
 0x144   :  { %v479_v60 = vsub.f32 1.0, %v1957_v36  ;;  %v485_v62 = vmul.f32 0.0, %v1957_v36 }
 0x19a   :  { %v470_v38 = vpop.permute.xlu0 %469 }
 0x19b   :  { %v472_v40 = vmul.f32 %v1957_v36, %v470_v38  ;;  %v491_v42 = vpop.permute.xlu1 %490 }
 0x19d   :  { %474 = vrot.lane.b32.xlu0 %v472_v40, %s2156_s4 }
 0x19e   :  { %v489_v45 = vpop.permute.xlu0 %488 }
 0x19f   :  { %v492_v46 = vsel %vm93_vm0, %v489_v45, %v491_v42  ;;  %v502_v52 = vpop.permute.xlu1 %501 }
 0x1a0   :  { %v494_v47 = vadd.f32 %v492_v46, %v385_v41 }
 0x1a2   :  { %v1667_v48 = vmul.f32 -1.442695, %v494_v47 }
 0x1a4   :  { %1958 = vpow2.f32 %v1667_v48 }
 0x1ae   :  { %v1959_v49 = vpop.eup %1958 }
 0x1af   :  { %v498_v50 = vadd.f32 1.0, %v1959_v49 }
 0x1b1   :  { %1960 = vrcp.f32 %v498_v50 }
 0x1bb   :  { %v1961_v51 = vpop.eup %1960 }
 0x1bc   :  { %v504_v53 = vmul.f32 %v1961_v51, %v502_v52  ;;  %v511_v2 = vsub.f32 1.0, %v1961_v51  ;;  %v517_v4 = vmul.f32 0.0, %v1961_v51 }
 0x1be   :  { %506 = vrot.lane.b32.xlu1 %v504_v53, %s2156_s4 }
 0x20f   :  { %v475_v54 = vpop.permute.xlu0 %474 }
 0x210   :  { %v477_v55 = vadd.f32 %v475_v54, %v384_v30 }
 0x212   :  { %1962 = vtanh.f32 %v477_v55 }
 0x21c   :  { %v1963_v56 = vpop.eup %1962 }
 0x21d   :  { %481 = vrot.lane.b32.xlu0 %v1963_v56, %s2158_s1 }
 0x230   :  { %v507_v57 = vpop.permute.xlu1 %506 }
 0x231   :  { %v509_v58 = vadd.f32 %v507_v57, %v385_v41 }
 0x233   :  { %1964 = vtanh.f32 %v509_v58 }
 0x23d   :  { %v1965_v59 = vpop.eup %1964 }
 0x23e   :  { %513 = vrot.lane.b32.xlu1 %v1965_v59, %s2158_s1 }
 0x28f   :  { %v482_v61 = vpop.permute.xlu0 %481 }
 0x290   :  { %v484_v63 = vmul.f32 %v482_v61, %v479_v60 }
 0x292   :  { %v486_v0 = vadd.f32 %v485_v62, %v484_v63 }
 0x294   :  { %520 = vrot.lane.b32.xlu0 %v486_v0, %s2158_s1 }
 0x2b0   :  { %v514_v1 = vpop.permute.xlu1 %513 }
 0x2b1   :  { %v516_v3 = vmul.f32 %v514_v1, %v511_v2  ;;  %v666_v1 = vld [vmem:[#allocation2 + $0x10] sm:$0xff] }
 0x2b3   :  { %v518_v5 = vadd.f32 %v517_v4, %v516_v3 }
 0x306   :  { %v521_v6 = vpop.permute.xlu0 %520 }
 0x307   :  { %v2384_v8 = vsel %vm93_vm0, %v521_v6, %v518_v5 }
 0x308   :  { %1668 = vmatmul.mubr.msk.f32.vlgmr.msra.gmra.mrb[8].mxu1 %vm386_vm2, %v2384_v8 }
 0x309   :  { %1850 = vmatpush1.bf16.msra.mxu1 %v2266_v15  ;;  %877 = vmatprep.mubr.f32.mxu1 %v2155_v44 }
 0x30a   :  { %1852 = vmatprep.subr.bf16.mxu1 %v2272_v19 }
 0x30d   :  { %1854 = vmatpush1.bf16.msra.mxu1 %v2280_v29 }
 0x30e   :  { %1856 = vmatprep.subr.bf16.mxu1 %v2286_v31 }
 0x311   :  { %1858 = vmatpush1.bf16.msra.mxu1 %v2294_v37 }
 0x312   :  { %1860 = vmatprep.subr.bf16.mxu1 %v2300_v39 }
 0x315   :  { %1862 = vmatpush1.bf16.msra.mxu1 %v2309_v43 }
 0x316   :  { %1880 = vmatprep.subr.bf16.mxu1 %v2261_v9 }
 0x3db   :  { %v595_v11 = vpop.f32.mrb[8].mxu1 }
 0x3dc   :  { %v596_v12 = vadd.f32 %v595_v11, %v2357_v7  ;;  %v597_v13 = vpop.f32.mrb[9].mxu1 }
 0x3dd   :  { %v598_v14 = vadd.f32 %v597_v13, %v2360_v10 }
 0x3de   :  { %630 = vrot.lane.b32.xlu0 %v596_v12, %s2157_s6  ;;  %608 = vrot.lane.b32.xlu1 %v596_v12, %s2156_s4  ;;  %v600_v17 = vadd.f32 %v596_v12, %v524_v16 }
 0x3e0   :  { %v1669_v18 = vmul.f32 -1.442695, %v600_v17 }
 0x3e2   :  { %643 = vrot.lane.b32.xlu0 %v598_v14, %s2158_s1  ;;  %632 = vrot.lane.b32.xlu1 %v598_v14, %s2157_s6  ;;  %1966 = vpow2.f32 %v1669_v18  ;;  %v667_v14 = vld [vmem:[#allocation3 + $0x28] sm:$0xff] }
 0x3ec   :  { %v1967_v20 = vpop.eup %1966 }
 0x3ed   :  { %v604_v21 = vadd.f32 1.0, %v1967_v20 }
 0x3ef   :  { %1968 = vrcp.f32 %v604_v21 }
 0x3f9   :  { %v1969_v22 = vpop.eup %1968 }
 0x3fa   :  { %v618_v49 = vsub.f32 1.0, %v1969_v22 }
 0x450   :  { %v609_v23 = vpop.permute.xlu1 %608  ;;  %v631_v25 = vpop.permute.xlu0 %630 }
 0x451   :  { %v611_v24 = vmul.f32 %v1969_v22, %v609_v23 }
 0x453   :  { %613 = vrot.lane.b32.xlu1 %v611_v24, %s2156_s4 }
 0x454   :  { %v633_v26 = vpop.permute.xlu1 %632  ;;  %v644_v36 = vpop.permute.xlu0 %643 }
 0x455   :  { %v634_v28 = vsel %vm93_vm0, %v631_v25, %v633_v26 }
 0x456   :  { %v636_v30 = vadd.f32 %v634_v28, %v525_v27 }
 0x458   :  { %v1670_v32 = vmul.f32 -1.442695, %v636_v30 }
 0x45a   :  { %1970 = vpow2.f32 %v1670_v32 }
 0x464   :  { %v1971_v33 = vpop.eup %1970 }
 0x465   :  { %v640_v34 = vadd.f32 1.0, %v1971_v33 }
 0x467   :  { %1972 = vrcp.f32 %v640_v34 }
 0x471   :  { %v1973_v35 = vpop.eup %1972 }
 0x472   :  { %v646_v38 = vmul.f32 %v1973_v35, %v644_v36  ;;  %v653_v55 = vsub.f32 1.0, %v1973_v35  ;;  %v659_v57 = vmul.f32 %v1973_v35, %v2384_v8 }
 0x474   :  { %648 = vrot.lane.b32.xlu0 %v646_v38, %s2156_s4 }
 0x478   :  { %624 = vrot.lane.b32.xlu0 %v2384_v8, %s2157_s6 }
 0x4c5   :  { %v614_v40 = vpop.permute.xlu1 %613 }
 0x4c6   :  { %v616_v41 = vadd.f32 %v614_v40, %v524_v16 }
 0x4c8   :  { %1974 = vtanh.f32 %v616_v41 }
 0x4d2   :  { %v1975_v42 = vpop.eup %1974 }
 0x4d3   :  { %620 = vrot.lane.b32.xlu1 %v1975_v42, %s2158_s1 }
 0x4e6   :  { %v649_v45 = vpop.permute.xlu0 %648 }
 0x4e7   :  { %v651_v46 = vadd.f32 %v649_v45, %v525_v27 }
 0x4e9   :  { %1976 = vtanh.f32 %v651_v46 }
 0x4ea   :  { %v625_v48 = vpop.permute.xlu0 %624 }
 0x4eb   :  { %v627_v51 = vmul.f32 %v1969_v22, %v625_v48 }
 0x4f3   :  { %v1977_v47 = vpop.eup %1976 }
 0x4f4   :  { %655 = vrot.lane.b32.xlu1 %v1977_v47, %s2158_s1 }
 0x545   :  { %v621_v50 = vpop.permute.xlu1 %620 }
 0x546   :  { %v623_v52 = vmul.f32 %v621_v50, %v618_v49 }
 0x548   :  { %v628_v53 = vadd.f32 %v627_v51, %v623_v52 }
 0x54a   :  { %662 = vrot.lane.b32.xlu0 %v628_v53, %s2158_s1 }
 0x566   :  { %v656_v54 = vpop.permute.xlu1 %655 }
 0x567   :  { %v658_v56 = vmul.f32 %v656_v54, %v653_v55  ;;  %v808_v54 = vld [vmem:[#allocation2 + $0x18] sm:$0xff] }
 0x569   :  { %v660_v58 = vadd.f32 %v659_v57, %v658_v56 }
 0x5bc   :  { %v663_v59 = vpop.permute.xlu0 %662 }
 0x5bd   :  { %v2413_v60 = vsel %vm93_vm0, %v663_v59, %v660_v58 }
 0x5be   :  { %1671 = vmatmul.mubr.msk.f32.vlgmr.msra.gmra.mrb[10].mxu0 %vm386_vm2, %v2413_v60 }
 0x5bf   :  { %1866 = vmatpush1.bf16.msra.mxu0 %v2266_v15  ;;  %1019 = vmatprep.mubr.f32.mxu0 %v2155_v44 }
 0x5c0   :  { %1868 = vmatprep.subr.bf16.mxu0 %v2272_v19 }
 0x5c3   :  { %1870 = vmatpush1.bf16.msra.mxu0 %v2280_v29 }
 0x5c4   :  { %1872 = vmatprep.subr.bf16.mxu0 %v2286_v31 }
 0x5c7   :  { %1874 = vmatpush1.bf16.msra.mxu0 %v2294_v37 }
 0x5c8   :  { %1876 = vmatprep.subr.bf16.mxu0 %v2300_v39 }
 0x5cb   :  { %1878 = vmatpush1.bf16.msra.mxu0 %v2309_v43 }
 0x5cc   :  { %1896 = vmatprep.subr.bf16.mxu0 %v2261_v9 }
 0x691   :  { %v737_v61 = vpop.f32.mrb[10].mxu0 }
 0x692   :  { %v738_v62 = vadd.f32 %v737_v61, %v2357_v7  ;;  %v739_v63 = vpop.f32.mrb[11].mxu0 }
 0x693   :  { %v740_v0 = vadd.f32 %v739_v63, %v2360_v10  ;;  %v809_v63 = vld [vmem:[#allocation3 + $0x20] sm:$0xff] }
 0x694   :  { %772 = vrot.lane.b32.xlu0 %v738_v62, %s2157_s6  ;;  %750 = vrot.lane.b32.xlu1 %v738_v62, %s2156_s4  ;;  %v742_v2 = vadd.f32 %v738_v62, %v666_v1 }
 0x696   :  { %v1672_v3 = vmul.f32 -1.442695, %v742_v2 }
 0x698   :  { %785 = vrot.lane.b32.xlu0 %v740_v0, %s2158_s1  ;;  %774 = vrot.lane.b32.xlu1 %v740_v0, %s2157_s6  ;;  %1978 = vpow2.f32 %v1672_v3 }
 0x6a2   :  { %v1979_v4 = vpop.eup %1978 }
 0x6a3   :  { %v746_v5 = vadd.f32 1.0, %v1979_v4 }
 0x6a5   :  { %1980 = vrcp.f32 %v746_v5 }
 0x6af   :  { %v1981_v6 = vpop.eup %1980 }
 0x6b0   :  { %v760_v34 = vsub.f32 1.0, %v1981_v6 }
 0x706   :  { %v751_v8 = vpop.permute.xlu1 %750  ;;  %v773_v12 = vpop.permute.xlu0 %772 }
 0x707   :  { %v753_v11 = vmul.f32 %v1981_v6, %v751_v8 }
 0x709   :  { %755 = vrot.lane.b32.xlu1 %v753_v11, %s2156_s4 }
 0x70a   :  { %v775_v13 = vpop.permute.xlu1 %774  ;;  %v786_v23 = vpop.permute.xlu0 %785 }
 0x70b   :  { %v776_v16 = vsel %vm93_vm0, %v773_v12, %v775_v13 }
 0x70c   :  { %v778_v17 = vadd.f32 %v776_v16, %v667_v14 }
 0x70e   :  { %v1673_v18 = vmul.f32 -1.442695, %v778_v17 }
 0x710   :  { %1982 = vpow2.f32 %v1673_v18 }
 0x71a   :  { %v1983_v20 = vpop.eup %1982 }
 0x71b   :  { %v782_v21 = vadd.f32 1.0, %v1983_v20 }
 0x71d   :  { %1984 = vrcp.f32 %v782_v21 }
 0x727   :  { %v1985_v22 = vpop.eup %1984 }
 0x728   :  { %v788_v24 = vmul.f32 %v1985_v22, %v786_v23  ;;  %v795_v42 = vsub.f32 1.0, %v1985_v22  ;;  %v801_v46 = vmul.f32 %v1985_v22, %v2413_v60 }
 0x72a   :  { %790 = vrot.lane.b32.xlu0 %v788_v24, %s2156_s4 }
 0x72e   :  { %766 = vrot.lane.b32.xlu0 %v2413_v60, %s2157_s6 }
 0x77b   :  { %v756_v25 = vpop.permute.xlu1 %755 }
 0x77c   :  { %v758_v26 = vadd.f32 %v756_v25, %v666_v1 }
 0x77e   :  { %1986 = vtanh.f32 %v758_v26 }
 0x788   :  { %v1987_v27 = vpop.eup %1986 }
 0x789   :  { %762 = vrot.lane.b32.xlu1 %v1987_v27, %s2158_s1 }
 0x79c   :  { %v791_v28 = vpop.permute.xlu0 %790 }
 0x79d   :  { %v793_v30 = vadd.f32 %v791_v28, %v667_v14 }
 0x79f   :  { %1988 = vtanh.f32 %v793_v30 }
 0x7a0   :  { %v767_v33 = vpop.permute.xlu0 %766 }
 0x7a1   :  { %v769_v36 = vmul.f32 %v1981_v6, %v767_v33 }
 0x7a9   :  { %v1989_v32 = vpop.eup %1988 }
 0x7aa   :  { %797 = vrot.lane.b32.xlu1 %v1989_v32, %s2158_s1 }
 0x7fb   :  { %v763_v35 = vpop.permute.xlu1 %762 }
 0x7fc   :  { %v765_v38 = vmul.f32 %v763_v35, %v760_v34 }
 0x7fe   :  { %v770_v40 = vadd.f32 %v769_v36, %v765_v38 }
 0x800   :  { %804 = vrot.lane.b32.xlu0 %v770_v40, %s2158_s1  ;;  %v950_v40 = vld [vmem:[#allocation2 + $0x20] sm:$0xff] }
 0x81c   :  { %v798_v41 = vpop.permute.xlu1 %797 }
 0x81d   :  { %v800_v45 = vmul.f32 %v798_v41, %v795_v42 }
 0x81f   :  { %v802_v47 = vadd.f32 %v801_v46, %v800_v45 }
 0x872   :  { %v805_v48 = vpop.permute.xlu0 %804 }
 0x873   :  { %v2442_v49 = vsel %vm93_vm0, %v805_v48, %v802_v47 }
 0x874   :  { %1674 = vmatmul.mubr.msk.f32.vlgmr.msra.gmra.mrb[10].mxu1 %vm386_vm2, %v2442_v49 }
 0x875   :  { %1882 = vmatpush1.bf16.msra.mxu1 %v2266_v15  ;;  %1161 = vmatprep.mubr.f32.mxu1 %v2155_v44 }
 0x876   :  { %1884 = vmatprep.subr.bf16.mxu1 %v2272_v19 }
 0x879   :  { %1886 = vmatpush1.bf16.msra.mxu1 %v2280_v29 }
 0x87a   :  { %1888 = vmatprep.subr.bf16.mxu1 %v2286_v31 }
 0x87d   :  { %1890 = vmatpush1.bf16.msra.mxu1 %v2294_v37 }
 0x87e   :  { %1892 = vmatprep.subr.bf16.mxu1 %v2300_v39 }
 0x881   :  { %1894 = vmatpush1.bf16.msra.mxu1 %v2309_v43 }
 0x882   :  { %1912 = vmatprep.subr.bf16.mxu1 %v2261_v9 }
 0x947   :  { %v879_v50 = vpop.f32.mrb[10].mxu1 }
 0x948   :  { %v880_v51 = vadd.f32 %v879_v50, %v2357_v7  ;;  %v881_v52 = vpop.f32.mrb[11].mxu1 }
 0x949   :  { %v882_v53 = vadd.f32 %v881_v52, %v2360_v10  ;;  %v951_v52 = vld [vmem:[#allocation3 + $0x18] sm:$0xff] }
 0x94a   :  { %914 = vrot.lane.b32.xlu0 %v880_v51, %s2157_s6  ;;  %892 = vrot.lane.b32.xlu1 %v880_v51, %s2156_s4  ;;  %v884_v55 = vadd.f32 %v880_v51, %v808_v54 }
 0x94c   :  { %v1675_v56 = vmul.f32 -1.442695, %v884_v55 }
 0x94e   :  { %927 = vrot.lane.b32.xlu0 %v882_v53, %s2158_s1  ;;  %916 = vrot.lane.b32.xlu1 %v882_v53, %s2157_s6  ;;  %1990 = vpow2.f32 %v1675_v56 }
 0x958   :  { %v1991_v57 = vpop.eup %1990 }
 0x959   :  { %v888_v9 = vadd.f32 1.0, %v1991_v57 }
 0x95b   :  { %1992 = vrcp.f32 %v888_v9 }
 0x965   :  { %v1993_v58 = vpop.eup %1992 }
 0x966   :  { %v902_v20 = vsub.f32 1.0, %v1993_v58 }
 0x9bc   :  { %v893_v59 = vpop.permute.xlu1 %892  ;;  %v915_v61 = vpop.permute.xlu0 %914 }
 0x9bd   :  { %v895_v60 = vmul.f32 %v1993_v58, %v893_v59 }
 0x9bf   :  { %897 = vrot.lane.b32.xlu1 %v895_v60, %s2156_s4 }
 0x9c0   :  { %v917_v62 = vpop.permute.xlu1 %916  ;;  %v928_v6 = vpop.permute.xlu0 %927 }
 0x9c1   :  { %v918_v0 = vsel %vm93_vm0, %v915_v61, %v917_v62 }
 0x9c2   :  { %v920_v1 = vadd.f32 %v918_v0, %v809_v63 }
 0x9c4   :  { %v1676_v2 = vmul.f32 -1.442695, %v920_v1 }
 0x9c6   :  { %1994 = vpow2.f32 %v1676_v2 }
 0x9d0   :  { %v1995_v3 = vpop.eup %1994 }
 0x9d1   :  { %v924_v4 = vadd.f32 1.0, %v1995_v3 }
 0x9d3   :  { %1996 = vrcp.f32 %v924_v4 }
 0x9dd   :  { %v1997_v5 = vpop.eup %1996 }
 0x9de   :  { %v930_v8 = vmul.f32 %v1997_v5, %v928_v6  ;;  %v937_v26 = vsub.f32 1.0, %v1997_v5  ;;  %v943_v28 = vmul.f32 %v1997_v5, %v2442_v49 }
 0x9e0   :  { %932 = vrot.lane.b32.xlu0 %v930_v8, %s2156_s4 }
 0x9e4   :  { %908 = vrot.lane.b32.xlu0 %v2442_v49, %s2157_s6 }
 0xa31   :  { %v898_v11 = vpop.permute.xlu1 %897 }
 0xa32   :  { %v900_v12 = vadd.f32 %v898_v11, %v808_v54 }
 0xa34   :  { %1998 = vtanh.f32 %v900_v12 }
 0xa3e   :  { %v1999_v13 = vpop.eup %1998 }
 0xa3f   :  { %904 = vrot.lane.b32.xlu1 %v1999_v13, %s2158_s1 }
 0xa52   :  { %v933_v14 = vpop.permute.xlu0 %932 }
 0xa53   :  { %v935_v16 = vadd.f32 %v933_v14, %v809_v63 }
 0xa55   :  { %2000 = vtanh.f32 %v935_v16 }
 0xa56   :  { %v909_v18 = vpop.permute.xlu0 %908 }
 0xa57   :  { %v911_v22 = vmul.f32 %v1993_v58, %v909_v18 }
 0xa5f   :  { %v2001_v17 = vpop.eup %2000 }
 0xa60   :  { %939 = vrot.lane.b32.xlu1 %v2001_v17, %s2158_s1 }
 0xab1   :  { %v905_v21 = vpop.permute.xlu1 %904 }
 0xab2   :  { %v907_v23 = vmul.f32 %v905_v21, %v902_v20 }
 0xab4   :  { %v912_v24 = vadd.f32 %v911_v22, %v907_v23 }
 0xab6   :  { %946 = vrot.lane.b32.xlu0 %v912_v24, %s2158_s1 }
 0xad2   :  { %v940_v25 = vpop.permute.xlu1 %939 }
 0xad3   :  { %v942_v27 = vmul.f32 %v940_v25, %v937_v26 }
 0xad5   :  { %v944_v30 = vadd.f32 %v943_v28, %v942_v27  ;;  %v1093_v27 = vld [vmem:[#allocation3 + $0x10] sm:$0xff] }
 0xb28   :  { %v947_v32 = vpop.permute.xlu0 %946 }
 0xb29   :  { %v2471_v33 = vsel %vm93_vm0, %v947_v32, %v944_v30 }
 0xb2a   :  { %1677 = vmatmul.mubr.msk.f32.vlgmr.msra.gmra.mrb[12].mxu0 %vm386_vm2, %v2471_v33 }
 0xb2b   :  { %1898 = vmatpush1.bf16.msra.mxu0 %v2266_v15  ;;  %1303 = vmatprep.mubr.f32.mxu0 %v2155_v44 }
 0xb2c   :  { %1900 = vmatprep.subr.bf16.mxu0 %v2272_v19 }
 0xb2f   :  { %1902 = vmatpush1.bf16.msra.mxu0 %v2280_v29 }
 0xb30   :  { %1904 = vmatprep.subr.bf16.mxu0 %v2286_v31 }
 0xb33   :  { %1906 = vmatpush1.bf16.msra.mxu0 %v2294_v37 }
 0xb34   :  { %1908 = vmatprep.subr.bf16.mxu0 %v2300_v39 }
 0xb37   :  { %1910 = vmatpush1.bf16.msra.mxu0 %v2309_v43 }
 0xbfd   :  { %v1021_v34 = vpop.f32.mrb[12].mxu0 }
 0xbfe   :  { %v1022_v35 = vadd.f32 %v1021_v34, %v2357_v7  ;;  %v1023_v36 = vpop.f32.mrb[13].mxu0 }
 0xbff   :  { %v1024_v38 = vadd.f32 %v1023_v36, %v2360_v10 }
 0xc00   :  { %1056 = vrot.lane.b32.xlu0 %v1022_v35, %s2157_s6  ;;  %1034 = vrot.lane.b32.xlu1 %v1022_v35, %s2156_s4  ;;  %v1026_v41 = vadd.f32 %v1022_v35, %v950_v40 }
 0xc02   :  { %v1678_v42 = vmul.f32 -1.442695, %v1026_v41 }
 0xc04   :  { %1069 = vrot.lane.b32.xlu0 %v1024_v38, %s2158_s1  ;;  %1058 = vrot.lane.b32.xlu1 %v1024_v38, %s2157_s6  ;;  %2002 = vpow2.f32 %v1678_v42 }
 0xc0e   :  { %v2003_v45 = vpop.eup %2002 }
 0xc0f   :  { %v1030_v46 = vadd.f32 1.0, %v2003_v45 }
 0xc11   :  { %2004 = vrcp.f32 %v1030_v46 }
 0xc1b   :  { %v2005_v47 = vpop.eup %2004 }
 0xc1c   :  { %v1044_v3 = vsub.f32 1.0, %v2005_v47 }
 0xc72   :  { %v1035_v48 = vpop.permute.xlu1 %1034  ;;  %v1057_v50 = vpop.permute.xlu0 %1056 }
 0xc73   :  { %v1037_v49 = vmul.f32 %v2005_v47, %v1035_v48 }
 0xc75   :  { %1039 = vrot.lane.b32.xlu1 %v1037_v49, %s2156_s4 }
 0xc76   :  { %v1059_v51 = vpop.permute.xlu1 %1058  ;;  %v1070_v58 = vpop.permute.xlu0 %1069 }
 0xc77   :  { %v1060_v53 = vsel %vm93_vm0, %v1057_v50, %v1059_v51 }
 0xc78   :  { %v1062_v54 = vadd.f32 %v1060_v53, %v951_v52 }
 0xc7a   :  { %v1679_v55 = vmul.f32 -1.442695, %v1062_v54 }
 0xc7c   :  { %2006 = vpow2.f32 %v1679_v55 }
 0xc86   :  { %v2007_v56 = vpop.eup %2006 }
 0xc87   :  { %v1066_v57 = vadd.f32 1.0, %v2007_v56 }
 0xc89   :  { %2008 = vrcp.f32 %v1066_v57 }
 0xc93   :  { %v2009_v9 = vpop.eup %2008 }
 0xc94   :  { %v1072_v59 = vmul.f32 %v2009_v9, %v1070_v58  ;;  %v1079_v12 = vsub.f32 1.0, %v2009_v9  ;;  %v1085_v14 = vmul.f32 %v2009_v9, %v2471_v33 }
 0xc96   :  { %1074 = vrot.lane.b32.xlu0 %v1072_v59, %s2156_s4 }
 0xc9a   :  { %1050 = vrot.lane.b32.xlu0 %v2471_v33, %s2157_s6 }
 0xce7   :  { %v1040_v60 = vpop.permute.xlu1 %1039 }
 0xce8   :  { %v1042_v61 = vadd.f32 %v1040_v60, %v950_v40 }
 0xcea   :  { %2010 = vtanh.f32 %v1042_v61 }
 0xcf4   :  { %v2011_v62 = vpop.eup %2010 }
 0xcf5   :  { %1046 = vrot.lane.b32.xlu1 %v2011_v62, %s2158_s1 }
 0xd08   :  { %v1075_v63 = vpop.permute.xlu0 %1074 }
 0xd09   :  { %v1077_v0 = vadd.f32 %v1075_v63, %v951_v52 }
 0xd0b   :  { %2012 = vtanh.f32 %v1077_v0  ;;  %v1234_v0 = vld [vmem:[#allocation2 + $0x30] sm:$0xff] }
 0xd0c   :  { %v1051_v2 = vpop.permute.xlu0 %1050 }
 0xd0d   :  { %v1053_v5 = vmul.f32 %v2005_v47, %v1051_v2 }
 0xd15   :  { %v2013_v1 = vpop.eup %2012 }
 0xd16   :  { %1081 = vrot.lane.b32.xlu1 %v2013_v1, %s2158_s1 }
 0xd67   :  { %v1047_v4 = vpop.permute.xlu1 %1046 }
 0xd68   :  { %v1049_v6 = vmul.f32 %v1047_v4, %v1044_v3 }
 0xd6a   :  { %v1054_v8 = vadd.f32 %v1053_v5, %v1049_v6 }
 0xd6c   :  { %1088 = vrot.lane.b32.xlu0 %v1054_v8, %s2158_s1 }
 0xd88   :  { %v1082_v11 = vpop.permute.xlu1 %1081 }
 0xd89   :  { %v1084_v13 = vmul.f32 %v1082_v11, %v1079_v12 }
 0xd8b   :  { %v1086_v16 = vadd.f32 %v1085_v14, %v1084_v13  ;;  %v1235_v13 = vld [vmem:[#allocation3 + $0x8] sm:$0xff] }
 0xdde   :  { %v1089_v17 = vpop.permute.xlu0 %1088 }
 0xddf   :  { %v2499_v18 = vsel %vm93_vm0, %v1089_v17, %v1086_v16 }
 0xde0   :  { %1680 = vmatmul.mubr.msk.f32.vlgmr.msra.gmra.mrb[12].mxu1 %vm386_vm2, %v2499_v18 }
 0xde1   :  { %1914 = vmatpush1.bf16.msra.mxu1 %v2266_v15  ;;  %1445 = vmatprep.mubr.f32.mxu1 %v2155_v44 }
 0xde2   :  { %1916 = vmatprep.subr.bf16.mxu1 %v2272_v19  ;;  %v1092_v19 = vld [vmem:[#allocation2 + $0x28] sm:$0xff] }
 0xde5   :  { %1918 = vmatpush1.bf16.msra.mxu1 %v2280_v29 }
 0xde6   :  { %1920 = vmatprep.subr.bf16.mxu1 %v2286_v31 }
 0xde9   :  { %1922 = vmatpush1.bf16.msra.mxu1 %v2294_v37 }
 0xdea   :  { %1924 = vmatprep.subr.bf16.mxu1 %v2300_v39 }
 0xded   :  { %1926 = vmatpush1.bf16.msra.mxu1 %v2309_v43 }
 0xeb3   :  { %v1163_v20 = vpop.f32.mrb[12].mxu1 }
 0xeb4   :  { %v1164_v21 = vadd.f32 %v1163_v20, %v2357_v7  ;;  %v1165_v22 = vpop.f32.mrb[13].mxu1 }
 0xeb5   :  { %v1166_v15 = vadd.f32 %v1165_v22, %v2360_v10 }
 0xeb6   :  { %1198 = vrot.lane.b32.xlu0 %v1164_v21, %s2157_s6  ;;  %1176 = vrot.lane.b32.xlu1 %v1164_v21, %s2156_s4  ;;  %v1168_v29 = vadd.f32 %v1164_v21, %v1092_v19 }
 0xeb8   :  { %v1681_v31 = vmul.f32 -1.442695, %v1168_v29 }
 0xeba   :  { %1211 = vrot.lane.b32.xlu0 %v1166_v15, %s2158_s1  ;;  %1200 = vrot.lane.b32.xlu1 %v1166_v15, %s2157_s6  ;;  %2014 = vpow2.f32 %v1681_v31 }
 0xec4   :  { %v2015_v37 = vpop.eup %2014 }
 0xec5   :  { %v1172_v39 = vadd.f32 1.0, %v2015_v37 }
 0xec7   :  { %2016 = vrcp.f32 %v1172_v39 }
 0xed1   :  { %v2017_v43 = vpop.eup %2016 }
 0xed2   :  { %v1186_v49 = vsub.f32 1.0, %v2017_v43 }
 0xf28   :  { %v1177_v23 = vpop.permute.xlu1 %1176  ;;  %v1199_v25 = vpop.permute.xlu0 %1198 }
 0xf29   :  { %v1179_v24 = vmul.f32 %v2017_v43, %v1177_v23 }
 0xf2b   :  { %1181 = vrot.lane.b32.xlu1 %v1179_v24, %s2156_s4 }
 0xf2c   :  { %v1201_v26 = vpop.permute.xlu1 %1200  ;;  %v1212_v36 = vpop.permute.xlu0 %1211 }
 0xf2d   :  { %v1202_v28 = vsel %vm93_vm0, %v1199_v25, %v1201_v26 }
 0xf2e   :  { %v1204_v30 = vadd.f32 %v1202_v28, %v1093_v27 }
 0xf30   :  { %v1682_v32 = vmul.f32 -1.442695, %v1204_v30 }
 0xf32   :  { %2018 = vpow2.f32 %v1682_v32 }
 0xf3c   :  { %v2019_v33 = vpop.eup %2018 }
 0xf3d   :  { %v1208_v34 = vadd.f32 1.0, %v2019_v33 }
 0xf3f   :  { %2020 = vrcp.f32 %v1208_v34 }
 0xf49   :  { %v2021_v35 = vpop.eup %2020 }
 0xf4a   :  { %v1214_v38 = vmul.f32 %v2021_v35, %v1212_v36  ;;  %v1221_v55 = vsub.f32 1.0, %v2021_v35  ;;  %v1227_v57 = vmul.f32 %v2021_v35, %v2499_v18 }
 0xf4c   :  { %1216 = vrot.lane.b32.xlu0 %v1214_v38, %s2156_s4 }
 0xf50   :  { %1192 = vrot.lane.b32.xlu0 %v2499_v18, %s2157_s6 }
 0xf9d   :  { %v1182_v40 = vpop.permute.xlu1 %1181 }
 0xf9e   :  { %v1184_v41 = vadd.f32 %v1182_v40, %v1092_v19 }
 0xfa0   :  { %2022 = vtanh.f32 %v1184_v41 }
 0xfaa   :  { %v2023_v42 = vpop.eup %2022 }
 0xfab   :  { %1188 = vrot.lane.b32.xlu1 %v2023_v42, %s2158_s1 }
 0xfbe   :  { %v1217_v45 = vpop.permute.xlu0 %1216 }
 0xfbf   :  { %v1219_v46 = vadd.f32 %v1217_v45, %v1093_v27 }
 0xfc1   :  { %2024 = vtanh.f32 %v1219_v46  ;;  %v1376_v46 = vld [vmem:[#allocation2 + $0x38] sm:$0xff] }
 0xfc2   :  { %v1193_v48 = vpop.permute.xlu0 %1192 }
 0xfc3   :  { %v1195_v51 = vmul.f32 %v2017_v43, %v1193_v48 }
 0xfcb   :  { %v2025_v47 = vpop.eup %2024 }
 0xfcc   :  { %1223 = vrot.lane.b32.xlu1 %v2025_v47, %s2158_s1 }
0x101d   :  { %v1189_v50 = vpop.permute.xlu1 %1188 }
0x101e   :  { %v1191_v52 = vmul.f32 %v1189_v50, %v1186_v49 }
0x1020   :  { %v1196_v53 = vadd.f32 %v1195_v51, %v1191_v52 }
0x1022   :  { %1230 = vrot.lane.b32.xlu0 %v1196_v53, %s2158_s1 }
0x103e   :  { %v1224_v54 = vpop.permute.xlu1 %1223 }
0x103f   :  { %v1226_v56 = vmul.f32 %v1224_v54, %v1221_v55  ;;  %v1377_v55 = vld [vmem:[#allocation3] sm:$0xff] }
0x1041   :  { %v1228_v9 = vadd.f32 %v1227_v57, %v1226_v56 }
0x1094   :  { %v1231_v58 = vpop.permute.xlu0 %1230 }
0x1095   :  { %v1233_v59 = vsel %vm93_vm0, %v1231_v58, %v1228_v9 }
0x1096   :  { %1683 = vmatmul.mubr.msk.f32.vlgmr.msra.gmra.mrb[14].mxu0 %vm386_vm2, %v1233_v59 }
0x1097   :  { %1780 = vmatprep.mubr.msk.f32.mxu0 %vm2160_vm3, %v2155_v44  ;;  %v1689_v44 = vld [vmem:[%s2613_s8] ss:$0 sm:$0xff]  ;;  %s2161_s8 = smov 72  }
0x1169   :  { %v1305_v60 = vpop.f32.mrb[14].mxu0 }
0x116a   :  { %v1306_v61 = vadd.f32 %v1305_v60, %v2357_v7  ;;  %v1307_v62 = vpop.f32.mrb[15].mxu0 }
0x116b   :  { %v1308_v63 = vadd.f32 %v1307_v62, %v2360_v10 }
0x116c   :  { %1340 = vrot.lane.b32.xlu0 %v1306_v61, %s2157_s6  ;;  %1318 = vrot.lane.b32.xlu1 %v1306_v61, %s2156_s4  ;;  %v1310_v1 = vadd.f32 %v1306_v61, %v1234_v0 }
0x116e   :  { %v1684_v2 = vmul.f32 -1.442695, %v1310_v1 }
0x1170   :  { %1353 = vrot.lane.b32.xlu0 %v1308_v63, %s2158_s1  ;;  %1342 = vrot.lane.b32.xlu1 %v1308_v63, %s2157_s6  ;;  %2026 = vpow2.f32 %v1684_v2 }
0x117a   :  { %v2027_v3 = vpop.eup %2026 }
0x117b   :  { %v1314_v4 = vadd.f32 1.0, %v2027_v3  ;;  %v1518_v3 = vld [vmem:[%s2612_s7] sm:$0xff] }
0x117d   :  { %2028 = vrcp.f32 %v1314_v4  ;;  %v1519_v4 = vld [vmem:[%s2612_s7 + $0x8] sm:$0xff] }
0x1187   :  { %v2029_v5 = vpop.eup %2028 }
0x1188   :  { %v1328_v24 = vsub.f32 1.0, %v2029_v5 }
0x11de   :  { %v1319_v6 = vpop.permute.xlu1 %1318  ;;  %v1341_v11 = vpop.permute.xlu0 %1340 }
0x11df   :  { %v1321_v8 = vmul.f32 %v2029_v5, %v1319_v6  ;;  %v2159_v6 = vmov 0.0|0.0  }
0x11e0   :  { %1927 = vmatprep.subr.bf16.mxu0 %v2159_v6 }
0x11e1   :  { %1323 = vrot.lane.b32.xlu1 %v1321_v8, %s2156_s4  ;;  %v1928_v8 = vpack.c.bf16 %v1519_v4, %v1518_v3 }
0x11e2   :  { %v1343_v12 = vpop.permute.xlu1 %1342  ;;  %v1354_v22 = vpop.permute.xlu0 %1353 }
0x11e3   :  { %v1344_v14 = vsel %vm93_vm0, %v1341_v11, %v1343_v12  ;;  %v1521_v11 = vld [vmem:[%s2612_s7 + $0x18] sm:$0xff]  ;;  %1929 = vmatpush3.bf16.msra.mxu0 %v1928_v8 }
0x11e4   :  { %v1346_v16 = vadd.f32 %v1344_v14, %v1235_v13  ;;  %1930 = vmatprep.subr.bf16.mxu0 %v2159_v6  ;;  %v1523_v14 = vld [vmem:[%s2612_s7 + $0x28] sm:$0xff] }
0x11e6   :  { %v1685_v17 = vmul.f32 -1.442695, %v1346_v16 }
0x11e8   :  { %2030 = vpow2.f32 %v1685_v17  ;;  %v1524_v17 = vld [vmem:[%s2612_s7 + $0x30] sm:$0xff] }
0x11f2   :  { %v2031_v18 = vpop.eup %2030 }
0x11f3   :  { %v1350_v20 = vadd.f32 1.0, %v2031_v18  ;;  %v1525_v18 = vld [vmem:[%s2612_s7 + $0x38] sm:$0xff] }
0x11f5   :  { %2032 = vrcp.f32 %v1350_v20 }
0x11ff   :  { %v2033_v21 = vpop.eup %2032 }
0x1200   :  { %v1356_v15 = vmul.f32 %v2033_v21, %v1354_v22  ;;  %v1363_v32 = vsub.f32 1.0, %v2033_v21  ;;  %v1369_v34 = vmul.f32 %v2033_v21, %v1233_v59  ;;  %v1937_v21 = vpack.c.bf16 %v1525_v18, %v1524_v17 }
0x1202   :  { %1358 = vrot.lane.b32.xlu0 %v1356_v15, %s2156_s4 }
0x1206   :  { %1334 = vrot.lane.b32.xlu0 %v1233_v59, %s2157_s6 }
0x1253   :  { %v1324_v19 = vpop.permute.xlu1 %1323 }
0x1254   :  { %v1326_v29 = vadd.f32 %v1324_v19, %v1234_v0 }
0x1256   :  { %2034 = vtanh.f32 %v1326_v29 }
0x1260   :  { %v2035_v31 = vpop.eup %2034 }
0x1261   :  { %1330 = vrot.lane.b32.xlu1 %v2035_v31, %s2158_s1 }
0x1274   :  { %v1359_v37 = vpop.permute.xlu0 %1358 }
0x1275   :  { %v1361_v39 = vadd.f32 %v1359_v37, %v1235_v13  ;;  %v1522_v13 = vld [vmem:[%s2612_s7 + $0x20] sm:$0xff] }
0x1276   :  { %v1934_v16 = vpack.c.bf16 %v1523_v14, %v1522_v13 }
0x1277   :  { %2036 = vtanh.f32 %v1361_v39 }
0x1278   :  { %v1335_v23 = vpop.permute.xlu0 %1334 }
0x1279   :  { %v1337_v26 = vmul.f32 %v2029_v5, %v1335_v23  ;;  %v1520_v5 = vld [vmem:[%s2612_s7 + $0x10] sm:$0xff] }
0x127a   :  { %v1931_v12 = vpack.c.bf16 %v1521_v11, %v1520_v5 }
0x127c   :  { %1932 = vmatpush3.bf16.msra.mxu0 %v1931_v12 }
0x127d   :  { %1933 = vmatprep.subr.bf16.mxu0 %v2159_v6 }
0x1280   :  { %1935 = vmatpush3.bf16.msra.mxu0 %v1934_v16 }
0x1281   :  { %v2037_v43 = vpop.eup %2036  ;;  %1936 = vmatprep.subr.bf16.mxu0 %v2159_v6 }
0x1282   :  { %1365 = vrot.lane.b32.xlu1 %v2037_v43, %s2158_s1 }
0x1284   :  { %1938 = vmatpush3.bf16.msra.mxu0 %v1937_v21 }
0x12d3   :  { %v1331_v25 = vpop.permute.xlu1 %1330 }
0x12d4   :  { %v1333_v27 = vmul.f32 %v1331_v25, %v1328_v24 }
0x12d6   :  { %v1338_v28 = vadd.f32 %v1337_v26, %v1333_v27 }
0x12d8   :  { %1372 = vrot.lane.b32.xlu0 %v1338_v28, %s2158_s1 }
0x12f4   :  { %v1366_v30 = vpop.permute.xlu1 %1365 }
0x12f5   :  { %v1368_v33 = vmul.f32 %v1366_v30, %v1363_v32 }
0x12f7   :  { %v1370_v35 = vadd.f32 %v1369_v34, %v1368_v33 }
0x134a   :  { %v1373_v36 = vpop.permute.xlu0 %1372 }
0x134b   :  { %v2542_v38 = vsel %vm93_vm0, %v1373_v36, %v1370_v35 }
0x134c   :  { %1686 = vmatmul.mubr.msk.f32.vlgmr.msra.gmra.mrb[14].mxu1 %vm386_vm2, %v2542_v38 }
0x141f   :  { %v1447_v40 = vpop.f32.mrb[14].mxu1 }
0x1420   :  { %v1448_v41 = vadd.f32 %v1447_v40, %v2357_v7  ;;  %v1449_v42 = vpop.f32.mrb[15].mxu1 }
0x1421   :  { %v1450_v45 = vadd.f32 %v1449_v42, %v2360_v10 }
0x1422   :  { %1482 = vrot.lane.b32.xlu0 %v1448_v41, %s2157_s6  ;;  %1460 = vrot.lane.b32.xlu1 %v1448_v41, %s2156_s4  ;;  %v1452_v47 = vadd.f32 %v1448_v41, %v1376_v46 }
0x1424   :  { %v1687_v48 = vmul.f32 -1.442695, %v1452_v47 }
0x1426   :  { %1495 = vrot.lane.b32.xlu0 %v1450_v45, %s2158_s1  ;;  %1484 = vrot.lane.b32.xlu1 %v1450_v45, %s2157_s6  ;;  %2038 = vpow2.f32 %v1687_v48 }
0x1430   :  { %v2039_v49 = vpop.eup %2038 }
0x1431   :  { %v1456_v50 = vadd.f32 1.0, %v2039_v49 }
0x1433   :  { %2040 = vrcp.f32 %v1456_v50 }
0x143d   :  { %v2041_v51 = vpop.eup %2040 }
0x143e   :  { %v1470_v15 = vsub.f32 1.0, %v2041_v51 }
0x1494   :  { %v1461_v7 = vpop.permute.xlu1 %1460  ;;  %v1483_v53 = vpop.permute.xlu0 %1482 }
0x1495   :  { %v1463_v52 = vmul.f32 %v2041_v51, %v1461_v7 }
0x1497   :  { %1465 = vrot.lane.b32.xlu1 %v1463_v52, %s2156_s4 }
0x1498   :  { %v1485_v54 = vpop.permute.xlu1 %1484  ;;  %v1496_v60 = vpop.permute.xlu0 %1495 }
0x1499   :  { %v1486_v10 = vsel %vm93_vm0, %v1483_v53, %v1485_v54 }
0x149a   :  { %v1488_v56 = vadd.f32 %v1486_v10, %v1377_v55 }
0x149c   :  { %v1688_v57 = vmul.f32 -1.442695, %v1488_v56 }
0x149e   :  { %2042 = vpow2.f32 %v1688_v57 }
0x14a8   :  { %v2043_v9 = vpop.eup %2042 }
0x14a9   :  { %v1492_v58 = vadd.f32 1.0, %v2043_v9 }
0x14ab   :  { %2044 = vrcp.f32 %v1492_v58 }
0x14b5   :  { %v2045_v59 = vpop.eup %2044 }
0x14b6   :  { %v1498_v61 = vmul.f32 %v2045_v59, %v1496_v60  ;;  %v1505_v43 = vsub.f32 1.0, %v2045_v59  ;;  %v1511_v24 = vmul.f32 %v2045_v59, %v2542_v38 }
0x14b8   :  { %1500 = vrot.lane.b32.xlu0 %v1498_v61, %s2156_s4 }
0x14bc   :  { %1476 = vrot.lane.b32.xlu0 %v2542_v38, %s2157_s6 }
0x1509   :  { %v1466_v62 = vpop.permute.xlu1 %1465 }
0x150a   :  { %v1468_v63 = vadd.f32 %v1466_v62, %v1376_v46 }
0x150c   :  { %2046 = vtanh.f32 %v1468_v63 }
0x1516   :  { %v2047_v0 = vpop.eup %2046 }
0x1517   :  { %1472 = vrot.lane.b32.xlu1 %v2047_v0, %s2158_s1 }
0x152a   :  { %v1501_v1 = vpop.permute.xlu0 %1500 }
0x152b   :  { %v1503_v2 = vadd.f32 %v1501_v1, %v1377_v55 }
0x152d   :  { %2048 = vtanh.f32 %v1503_v2 }
0x152e   :  { %v1477_v22 = vpop.permute.xlu0 %1476 }
0x152f   :  { %v1479_v29 = vmul.f32 %v2041_v51, %v1477_v22 }
0x1537   :  { %v2049_v20 = vpop.eup %2048 }
0x1538   :  { %1507 = vrot.lane.b32.xlu1 %v2049_v20, %s2158_s1 }
0x1589   :  { %v1473_v19 = vpop.permute.xlu1 %1472 }
0x158a   :  { %v1475_v31 = vmul.f32 %v1473_v19, %v1470_v15 }
0x158c   :  { %v1480_v37 = vadd.f32 %v1479_v29, %v1475_v31 }
0x158e   :  { %1514 = vrot.lane.b32.xlu0 %v1480_v37, %s2158_s1 }
0x15aa   :  { %v1508_v39 = vpop.permute.xlu1 %1507 }
0x15ab   :  { %v1510_v23 = vmul.f32 %v1508_v39, %v1505_v43 }
0x15ad   :  { %v1512_v25 = vadd.f32 %v1511_v24, %v1510_v23 }
0x1600   :  { %v1515_v26 = vpop.permute.xlu0 %1514 }
0x1601   :  { %v1517_v27 = vsel %vm93_vm0, %v1515_v26, %v1512_v25 }
0x1602   :  { %1781 = vmatmul.mubr.msk.f32.vlgmr.msra.gmra.mrb[16].mxu0 %vm386_vm2, %v1517_v27 }
0x16d5   :  { %v1602_v28 = vpop.f32.mrb[16].mxu0 }
0x16d6   :  { %v1603_v30 = vadd.f32 %v1689_v44, %v1602_v28  ;;  %v1782_v32 = vpop.f32.mrb[17].mxu0 }
0x16d8   :  { %v1607_v33 = vsel %vm1606_vm4, %v1603_v30, -inf }
0x16d9   :  { %1608 = vmax.xlane.f32.xlu1 %v1607_v33 }
0x1766   :  { %v1609_v34 = vpop.xlane.xlu1 %1608 }
0x1767   :  { %v1610_v35 = vsub.f32 %v1603_v30, %v1609_v34 }
0x1769   :  { %v1611_v36 = vmul.f32 1.442695, %v1610_v35 }
0x176b   :  { %2050 = vpow2.f32 %v1611_v36 }
0x1775   :  { %v2051_v38 = vpop.eup %2050 }
0x1776   :  { %v1613_v40 = vsel %vm1606_vm4, %v2051_v38, 0.0 }
0x1777   :  { %1614 = vadd.xlane.f32.xlu0 %v1613_v40 }
0x178d   :  { %1619 = vrot.lane.b32.xlu0 %v1603_v30, %s2156_s4 }
0x1804   :  { %v1615_v41 = vpop.xlane.xlu0 %1614 }
0x1805   :  { %2052 = vrcp.f32 %v1615_v41 }
0x1808   :  { %v1620_v46 = vpop.permute.xlu0 %1619 }
0x1809   :  { %v1626_v47 = vsel %vm386_vm2, %v1517_v27, %v1620_v46 }
0x180f   :  { %v2053_v42 = vpop.eup %2052 }
0x1810   :  { %v1617_v45 = vmul.f32 %v2053_v42, %v2051_v38 }
0x1812   :  { %1623 = vrot.lane.b32.xlu1 %v1617_v45, %s2161_s8 }
0x1884   :  { %v1624_v48 = vpop.permute.xlu1 %1623 }
0x1885   :  { %v1628_v49 = vsel %vm1627_vm5, %v1626_v47, %v1624_v48 }
0x1886   :  { %v1630_v50 = vsel %vm1629_vm6, %v1628_v49, 0.0 }
0x1887   :  { %1631 = vst [vmem:[#allocation10] sm:$0xff] %v1630_v50 }
0x1888   :  { %2131 = shalt.err (!%p2128_p0)
}
0x1889   :  { %s2132_s23 = scalar_lea.hbm %s2614_s9, 128 }
0x188a   :  { %p2133_p1 = scmp.ne.s32.totalorder %s2614_s9, %s2132_s23  ;;  %p2136_p2 = scmp.lt.u32.totalorder %s2132_s23, %s2614_s9 }
0x188c   :  { %p2138_p3 = pnand %p2136_p2, %p2133_p1 }
0x188e   :  { %2141 = shalt.err (!%p2138_p3)
}
0x188f   :  { %1641 = dma.vmem_to_hbm [thread:$0]  %s1639_s19, 128, %s2614_s9, [#allocation6]  }
0x1890   :  { %2146 = dma.done.wait [#allocation6], 128  }
0x1891   :  { %2147 = vsyncadd [#allocation6], 4294967168 }
0x1892   :  { %1645 = vsyncpa [#allocation5], 1 }
0x1893   :  { %1646 = vsyncpa [#allocation8], 1 }
0x1894   :  { %1647 = vsyncpa [#allocation6], 1 }

</bundles_post_ra>
